<compile_context>
chip_gen: v7x
topology: tpu7x:2x2x1
jax: 0.10.0
libtpu: 0.0.40
codegen_flags: <defaults>
</compile_context>

<pallas_src>
import jax
import jax.numpy as jnp
from jax.experimental import pallas as pl
from jax.experimental.pallas import tpu as pltpu

NEG_SLOPE = 0.8664262

C_IN, C_OUT = 30, 30
KH, KW = 8, 4
SH, SW = 2, 1
PH, PW = 4, 2

K_PAD = 128          # contraction dim KW*C_IN = 120, zero-padded to a full lane width
C_PAD = 128          # output channels 30, zero-padded to a full lane width


def _make_kernel(h_out, w_out_pad):
    m = h_out * w_out_pad                       # fused matmul M (multiple of 8)

    def kernel(xe_ref, xo_ref, w_ref, b_ref, o_ref, acc_ref):
        # xe_ref/xo_ref: (1, h_half*w_out_pad, K_PAD)  even/odd padded input rows,
        #                W-direction im2col already applied, lane dim = 128.
        # w_ref : (KH, K_PAD, C_PAD)   per-tap weights (K and C_out zero-padded)
        # b_ref : (1, C_PAD)
        # o_ref : (1, m, C_PAD)        flattened (h_out * w_out_pad) output rows
        # acc_ref: VMEM f32 scratch (m, C_PAD) accumulator
        acc_ref[...] = jnp.dot(xe_ref[0, pl.ds(0, m)], w_ref[0],
                               preferred_element_type=jnp.float32)
        for kh in range(1, KH):                 # one big matmul per KH tap
            src = xe_ref if kh % 2 == 0 else xo_ref
            start = (kh // 2) * w_out_pad       # static, 8-aligned sublane offset
            acc_ref[...] += jnp.dot(src[0, pl.ds(start, m)], w_ref[kh],
                                    preferred_element_type=jnp.float32)
        y = acc_ref[...] + b_ref[...]           # single bias broadcast
        o_ref[0] = jnp.where(y > 0, y, y * NEG_SLOPE)

    return kernel


def prepare_params(weight, bias):
    """One-time repack: (C_out, C_in, KH, KW) -> (KH, K_PAD, C_PAD), bias -> (1, C_PAD)."""
    w_r = weight.transpose(2, 3, 1, 0).reshape(KH, KW * C_IN, C_OUT).astype(jnp.float32)
    w_r = jnp.pad(w_r, ((0, 0), (0, K_PAD - KW * C_IN), (0, C_PAD - C_OUT)))
    b_r = jnp.pad(bias.reshape(1, C_OUT).astype(jnp.float32),
                  ((0, 0), (0, C_PAD - C_OUT)))
    return w_r, b_r


@jax.jit
def conv2d_leakyrelu(x, w_r, b_r):
    """x: (N, C_in, H, W) f32; w_r/b_r from prepare_params.  Returns NCHW output."""
    N, C, H, W = x.shape
    assert C == C_IN and SH == 2 and SW == 1
    h_out = (H + 2 * PH - KH) // SH + 1
    w_out = (W + 2 * PW - KW) // SW + 1
    w_out_pad = ((w_out + 7) // 8) * 8           # tile-aligned row group (24 for W=16)
    h_half = h_out + KH // 2 - 1                 # padded rows needed per parity
    h_pad_eff = 2 * h_half
    pad_bottom = h_pad_eff - H - PH
    pad_right = (w_out_pad - 1) * SW + KW - W - PW
    assert pad_bottom >= 0 and pad_right >= 0

    # --- cheap glue: NHWC + pad, W-direction im2col (4 slices + zero K tail) ---
    x_p = jnp.pad(x.transpose(0, 2, 3, 1).astype(jnp.float32),
                  ((0, 0), (PH, pad_bottom), (PW, pad_right), (0, 0)))
    zeros_tail = jnp.zeros((N, h_pad_eff, w_out_pad, K_PAD - KW * C_IN), jnp.float32)
    xw = jnp.concatenate(
        [x_p[:, :, kw:kw + w_out_pad, :] for kw in range(KW)] + [zeros_tail],
        axis=-1)                                 # (N, h_pad_eff, w_out_pad, 128)
    # Even/odd row split turns the stride-2 H access into contiguous slices.
    xe = xw[:, 0::2].reshape(N, h_half * w_out_pad, K_PAD)
    xo = xw[:, 1::2].reshape(N, h_half * w_out_pad, K_PAD)

    m = h_out * w_out_pad
    kernel = _make_kernel(h_out, w_out_pad)
    out = pl.pallas_call(
        kernel,
        out_shape=jax.ShapeDtypeStruct((N, m, C_PAD), jnp.float32),
        grid=(N,),
        in_specs=[
            pl.BlockSpec((1, h_half * w_out_pad, K_PAD), lambda n: (n, 0, 0)),
            pl.BlockSpec((1, h_half * w_out_pad, K_PAD), lambda n: (n, 0, 0)),
            pl.BlockSpec((KH, K_PAD, C_PAD), lambda n: (0, 0, 0)),   # resident block
            pl.BlockSpec((1, C_PAD), lambda n: (0, 0)),
        ],
        out_specs=pl.BlockSpec((1, m, C_PAD), lambda n: (n, 0, 0)),
        scratch_shapes=[pltpu.VMEM((m, C_PAD), jnp.float32)],
        compiler_params=pltpu.CompilerParams(
            dimension_semantics=("parallel",),   # v7x: one batch element per TC
        ),
    )(xe, xo, w_r, b_r)

    # (N, h_out*w_out_pad, C_PAD) -> real spatial/channel extents -> NCHW
    out = out.reshape(N, h_out, w_out_pad, C_PAD)[:, :, :w_out, :C_OUT]
    return out.transpose(0, 3, 1, 2)


if __name__ == "__main__":
    key = jax.random.PRNGKey(0)
    kx, kw_key, kb_key = jax.random.split(key, 3)

    # Deterministic parameter init (mimics PyTorch's uniform(-1/sqrt(fan_in), ..))
    fan_in = C_IN * KH * KW
    bound = 1.0 / (fan_in ** 0.5)
    weight = jax.random.uniform(kw_key, (C_OUT, C_IN, KH, KW),
                                minval=-bound, maxval=bound, dtype=jnp.float32)
    bias = jax.random.uniform(kb_key, (C_OUT,),
                              minval=-bound, maxval=bound, dtype=jnp.float32)

    # Small input consistent with the module: N=2, C_in=30, H=W=16
    x = jax.random.normal(kx, (2, C_IN, 16, 16), dtype=jnp.float32)

    w_r, b_r = prepare_params(weight, bias)     # hoisted out of the hot path
    out = conv2d_leakyrelu(x, w_r, b_r)
    jax.block_until_ready(out)

    # Sanity check against pure-JAX reference
    ref = jax.lax.conv_general_dilated(
        x, weight, window_strides=(SH, SW), padding=((PH, PH), (PW, PW)),
        dimension_numbers=("NCHW", "OIHW", "NCHW"),
    ) + bias.reshape(1, C_OUT, 1, 1)
    ref = jnp.where(ref > 0, ref, ref * NEG_SLOPE)
    assert out.shape == ref.shape, (out.shape, ref.shape)
    assert jnp.allclose(out, ref, atol=2e-4, rtol=2e-4), \
        float(jnp.max(jnp.abs(out - ref)))

    print("KERNEL_OK")
</pallas_src>

<mosaic_0001>
module attributes {stable_mosaic.version = 11 : i64} {
  func.func @kernel(%arg0: i32, %arg1: memref<1x288x128xf32, #tpu.memory_space<vmem>>, %arg2: memref<1x288x128xf32, #tpu.memory_space<vmem>>, %arg3: memref<8x128x128xf32, #tpu.memory_space<vmem>>, %arg4: memref<1x128xf32, #tpu.memory_space<vmem>>, %arg5: memref<1x216x128xf32, #tpu.memory_space<vmem>>, %arg6: memref<216x128xf32, #tpu.memory_space<vmem>>) attributes {dimension_semantics = [#tpu.dimension_semantics<parallel>], iteration_bounds = array<i64: 2>, scalar_prefetch = 0 : i64, scratch_operands = 1 : i64, tpu.core_type = #tpu.core_type<tc>, window_params = [{transform_indices = @transform_0, window_bounds = array<i64: 1, 288, 128>}, {transform_indices = @transform_1, window_bounds = array<i64: 1, 288, 128>}, {pipeline_mode = #tpu.pipeline_mode<synchronous>, transform_indices = @transform_2, window_bounds = array<i64: 8, 128, 128>}, {pipeline_mode = #tpu.pipeline_mode<synchronous>, transform_indices = @transform_3, window_bounds = array<i64: 1, 128>}, {transform_indices = @transform_4, window_bounds = array<i64: 1, 216, 128>}]} {
    %c0 = arith.constant 0 : index
    %c0_0 = arith.constant 0 : index
    %c0_1 = arith.constant 0 : index
    %0 = vector.load %arg1[%c0, %c0_0, %c0_1] : memref<1x288x128xf32, #tpu.memory_space<vmem>>, vector<1x216x128xf32>
    %1 = vector.shape_cast %0 : vector<1x216x128xf32> to vector<216x128xf32>
    %c0_2 = arith.constant 0 : index
    %c0_3 = arith.constant 0 : index
    %c0_4 = arith.constant 0 : index
    %2 = vector.load %arg3[%c0_2, %c0_3, %c0_4] : memref<8x128x128xf32, #tpu.memory_space<vmem>>, vector<1x128x128xf32>
    %3 = vector.shape_cast %2 : vector<1x128x128xf32> to vector<128x128xf32>
    %cst = arith.constant dense<0.000000e+00> : vector<216x128xf32>
    %4 = tpu.matmul %1, %3, %cst {dimension_numbers = #tpu.dot_dimension_numbers<[1], [0], [0], [1], [0, 0, 1, 1], [], []>} : vector<216x128xf32>, vector<128x128xf32>, vector<216x128xf32> -> vector<216x128xf32>
    %c0_5 = arith.constant 0 : index
    %c0_6 = arith.constant 0 : index
    %5 = vector.load %arg6[%c0_5, %c0_6] : memref<216x128xf32, #tpu.memory_space<vmem>>, vector<216x128xf32>
    tpu.vector_store %arg6[%c0_5, %c0_6], %4 {strides = array<i32>} : memref<216x128xf32, #tpu.memory_space<vmem>>, vector<216x128xf32>,
    %c0_7 = arith.constant 0 : index
    %c0_8 = arith.constant 0 : index
    %6 = vector.load %arg6[%c0_7, %c0_8] : memref<216x128xf32, #tpu.memory_space<vmem>>, vector<216x128xf32>
    %c0_9 = arith.constant 0 : index
    %c0_10 = arith.constant 0 : index
    %c0_11 = arith.constant 0 : index
    %7 = vector.load %arg2[%c0_9, %c0_10, %c0_11] : memref<1x288x128xf32, #tpu.memory_space<vmem>>, vector<1x216x128xf32>
    %8 = vector.shape_cast %7 : vector<1x216x128xf32> to vector<216x128xf32>
    %c1 = arith.constant 1 : index
    %c0_12 = arith.constant 0 : index
    %c0_13 = arith.constant 0 : index
    %9 = vector.load %arg3[%c1, %c0_12, %c0_13] : memref<8x128x128xf32, #tpu.memory_space<vmem>>, vector<1x128x128xf32>
    %10 = vector.shape_cast %9 : vector<1x128x128xf32> to vector<128x128xf32>
    %cst_14 = arith.constant dense<0.000000e+00> : vector<216x128xf32>
    %11 = tpu.matmul %8, %10, %cst_14 {dimension_numbers = #tpu.dot_dimension_numbers<[1], [0], [0], [1], [0, 0, 1, 1], [], []>} : vector<216x128xf32>, vector<128x128xf32>, vector<216x128xf32> -> vector<216x128xf32>
    %12 = arith.addf %6, %11 : vector<216x128xf32>
    %c0_15 = arith.constant 0 : index
    %c0_16 = arith.constant 0 : index
    %13 = vector.load %arg6[%c0_15, %c0_16] : memref<216x128xf32, #tpu.memory_space<vmem>>, vector<216x128xf32>
    tpu.vector_store %arg6[%c0_15, %c0_16], %12 {strides = array<i32>} : memref<216x128xf32, #tpu.memory_space<vmem>>, vector<216x128xf32>,
    %c0_17 = arith.constant 0 : index
    %c0_18 = arith.constant 0 : index
    %14 = vector.load %arg6[%c0_17, %c0_18] : memref<216x128xf32, #tpu.memory_space<vmem>>, vector<216x128xf32>
    %c0_19 = arith.constant 0 : index
    %c24 = arith.constant 24 : index
    %c0_20 = arith.constant 0 : index
    %15 = vector.load %arg1[%c0_19, %c24, %c0_20] : memref<1x288x128xf32, #tpu.memory_space<vmem>>, vector<1x216x128xf32>
    %16 = vector.shape_cast %15 : vector<1x216x128xf32> to vector<216x128xf32>
    %c2 = arith.constant 2 : index
    %c0_21 = arith.constant 0 : index
    %c0_22 = arith.constant 0 : index
    %17 = vector.load %arg3[%c2, %c0_21, %c0_22] : memref<8x128x128xf32, #tpu.memory_space<vmem>>, vector<1x128x128xf32>
    %18 = vector.shape_cast %17 : vector<1x128x128xf32> to vector<128x128xf32>
    %cst_23 = arith.constant dense<0.000000e+00> : vector<216x128xf32>
    %19 = tpu.matmul %16, %18, %cst_23 {dimension_numbers = #tpu.dot_dimension_numbers<[1], [0], [0], [1], [0, 0, 1, 1], [], []>} : vector<216x128xf32>, vector<128x128xf32>, vector<216x128xf32> -> vector<216x128xf32>
    %20 = arith.addf %14, %19 : vector<216x128xf32>
    %c0_24 = arith.constant 0 : index
    %c0_25 = arith.constant 0 : index
    %21 = vector.load %arg6[%c0_24, %c0_25] : memref<216x128xf32, #tpu.memory_space<vmem>>, vector<216x128xf32>
    tpu.vector_store %arg6[%c0_24, %c0_25], %20 {strides = array<i32>} : memref<216x128xf32, #tpu.memory_space<vmem>>, vector<216x128xf32>,
    %c0_26 = arith.constant 0 : index
    %c0_27 = arith.constant 0 : index
    %22 = vector.load %arg6[%c0_26, %c0_27] : memref<216x128xf32, #tpu.memory_space<vmem>>, vector<216x128xf32>
    %c0_28 = arith.constant 0 : index
    %c24_29 = arith.constant 24 : index
    %c0_30 = arith.constant 0 : index
    %23 = vector.load %arg2[%c0_28, %c24_29, %c0_30] : memref<1x288x128xf32, #tpu.memory_space<vmem>>, vector<1x216x128xf32>
    %24 = vector.shape_cast %23 : vector<1x216x128xf32> to vector<216x128xf32>
    %c3 = arith.constant 3 : index
    %c0_31 = arith.constant 0 : index
    %c0_32 = arith.constant 0 : index
    %25 = vector.load %arg3[%c3, %c0_31, %c0_32] : memref<8x128x128xf32, #tpu.memory_space<vmem>>, vector<1x128x128xf32>
    %26 = vector.shape_cast %25 : vector<1x128x128xf32> to vector<128x128xf32>
    %cst_33 = arith.constant dense<0.000000e+00> : vector<216x128xf32>
    %27 = tpu.matmul %24, %26, %cst_33 {dimension_numbers = #tpu.dot_dimension_numbers<[1], [0], [0], [1], [0, 0, 1, 1], [], []>} : vector<216x128xf32>, vector<128x128xf32>, vector<216x128xf32> -> vector<216x128xf32>
    %28 = arith.addf %22, %27 : vector<216x128xf32>
    %c0_34 = arith.constant 0 : index
    %c0_35 = arith.constant 0 : index
    %29 = vector.load %arg6[%c0_34, %c0_35] : memref<216x128xf32, #tpu.memory_space<vmem>>, vector<216x128xf32>
    tpu.vector_store %arg6[%c0_34, %c0_35], %28 {strides = array<i32>} : memref<216x128xf32, #tpu.memory_space<vmem>>, vector<216x128xf32>,
    %c0_36 = arith.constant 0 : index
    %c0_37 = arith.constant 0 : index
    %30 = vector.load %arg6[%c0_36, %c0_37] : memref<216x128xf32, #tpu.memory_space<vmem>>, vector<216x128xf32>
    %c0_38 = arith.constant 0 : index
    %c48 = arith.constant 48 : index
    %c0_39 = arith.constant 0 : index
    %31 = vector.load %arg1[%c0_38, %c48, %c0_39] : memref<1x288x128xf32, #tpu.memory_space<vmem>>, vector<1x216x128xf32>
    %32 = vector.shape_cast %31 : vector<1x216x128xf32> to vector<216x128xf32>
    %c4 = arith.constant 4 : index
    %c0_40 = arith.constant 0 : index
    %c0_41 = arith.constant 0 : index
    %33 = vector.load %arg3[%c4, %c0_40, %c0_41] : memref<8x128x128xf32, #tpu.memory_space<vmem>>, vector<1x128x128xf32>
    %34 = vector.shape_cast %33 : vector<1x128x128xf32> to vector<128x128xf32>
    %cst_42 = arith.constant dense<0.000000e+00> : vector<216x128xf32>
    %35 = tpu.matmul %32, %34, %cst_42 {dimension_numbers = #tpu.dot_dimension_numbers<[1], [0], [0], [1], [0, 0, 1, 1], [], []>} : vector<216x128xf32>, vector<128x128xf32>, vector<216x128xf32> -> vector<216x128xf32>
    %36 = arith.addf %30, %35 : vector<216x128xf32>
    %c0_43 = arith.constant 0 : index
    %c0_44 = arith.constant 0 : index
    %37 = vector.load %arg6[%c0_43, %c0_44] : memref<216x128xf32, #tpu.memory_space<vmem>>, vector<216x128xf32>
    tpu.vector_store %arg6[%c0_43, %c0_44], %36 {strides = array<i32>} : memref<216x128xf32, #tpu.memory_space<vmem>>, vector<216x128xf32>,
    %c0_45 = arith.constant 0 : index
    %c0_46 = arith.constant 0 : index
    %38 = vector.load %arg6[%c0_45, %c0_46] : memref<216x128xf32, #tpu.memory_space<vmem>>, vector<216x128xf32>
    %c0_47 = arith.constant 0 : index
    %c48_48 = arith.constant 48 : index
    %c0_49 = arith.constant 0 : index
    %39 = vector.load %arg2[%c0_47, %c48_48, %c0_49] : memref<1x288x128xf32, #tpu.memory_space<vmem>>, vector<1x216x128xf32>
    %40 = vector.shape_cast %39 : vector<1x216x128xf32> to vector<216x128xf32>
    %c5 = arith.constant 5 : index
    %c0_50 = arith.constant 0 : index
    %c0_51 = arith.constant 0 : index
    %41 = vector.load %arg3[%c5, %c0_50, %c0_51] : memref<8x128x128xf32, #tpu.memory_space<vmem>>, vector<1x128x128xf32>
    %42 = vector.shape_cast %41 : vector<1x128x128xf32> to vector<128x128xf32>
    %cst_52 = arith.constant dense<0.000000e+00> : vector<216x128xf32>
    %43 = tpu.matmul %40, %42, %cst_52 {dimension_numbers = #tpu.dot_dimension_numbers<[1], [0], [0], [1], [0, 0, 1, 1], [], []>} : vector<216x128xf32>, vector<128x128xf32>, vector<216x128xf32> -> vector<216x128xf32>
    %44 = arith.addf %38, %43 : vector<216x128xf32>
    %c0_53 = arith.constant 0 : index
    %c0_54 = arith.constant 0 : index
    %45 = vector.load %arg6[%c0_53, %c0_54] : memref<216x128xf32, #tpu.memory_space<vmem>>, vector<216x128xf32>
    tpu.vector_store %arg6[%c0_53, %c0_54], %44 {strides = array<i32>} : memref<216x128xf32, #tpu.memory_space<vmem>>, vector<216x128xf32>,
    %c0_55 = arith.constant 0 : index
    %c0_56 = arith.constant 0 : index
    %46 = vector.load %arg6[%c0_55, %c0_56] : memref<216x128xf32, #tpu.memory_space<vmem>>, vector<216x128xf32>
    %c0_57 = arith.constant 0 : index
    %c72 = arith.constant 72 : index
    %c0_58 = arith.constant 0 : index
    %47 = vector.load %arg1[%c0_57, %c72, %c0_58] : memref<1x288x128xf32, #tpu.memory_space<vmem>>, vector<1x216x128xf32>
    %48 = vector.shape_cast %47 : vector<1x216x128xf32> to vector<216x128xf32>
    %c6 = arith.constant 6 : index
    %c0_59 = arith.constant 0 : index
    %c0_60 = arith.constant 0 : index
    %49 = vector.load %arg3[%c6, %c0_59, %c0_60] : memref<8x128x128xf32, #tpu.memory_space<vmem>>, vector<1x128x128xf32>
    %50 = vector.shape_cast %49 : vector<1x128x128xf32> to vector<128x128xf32>
    %cst_61 = arith.constant dense<0.000000e+00> : vector<216x128xf32>
    %51 = tpu.matmul %48, %50, %cst_61 {dimension_numbers = #tpu.dot_dimension_numbers<[1], [0], [0], [1], [0, 0, 1, 1], [], []>} : vector<216x128xf32>, vector<128x128xf32>, vector<216x128xf32> -> vector<216x128xf32>
    %52 = arith.addf %46, %51 : vector<216x128xf32>
    %c0_62 = arith.constant 0 : index
    %c0_63 = arith.constant 0 : index
    %53 = vector.load %arg6[%c0_62, %c0_63] : memref<216x128xf32, #tpu.memory_space<vmem>>, vector<216x128xf32>
    tpu.vector_store %arg6[%c0_62, %c0_63], %52 {strides = array<i32>} : memref<216x128xf32, #tpu.memory_space<vmem>>, vector<216x128xf32>,
    %c0_64 = arith.constant 0 : index
    %c0_65 = arith.constant 0 : index
    %54 = vector.load %arg6[%c0_64, %c0_65] : memref<216x128xf32, #tpu.memory_space<vmem>>, vector<216x128xf32>
    %c0_66 = arith.constant 0 : index
    %c72_67 = arith.constant 72 : index
    %c0_68 = arith.constant 0 : index
    %55 = vector.load %arg2[%c0_66, %c72_67, %c0_68] : memref<1x288x128xf32, #tpu.memory_space<vmem>>, vector<1x216x128xf32>
    %56 = vector.shape_cast %55 : vector<1x216x128xf32> to vector<216x128xf32>
    %c7 = arith.constant 7 : index
    %c0_69 = arith.constant 0 : index
    %c0_70 = arith.constant 0 : index
    %57 = vector.load %arg3[%c7, %c0_69, %c0_70] : memref<8x128x128xf32, #tpu.memory_space<vmem>>, vector<1x128x128xf32>
    %58 = vector.shape_cast %57 : vector<1x128x128xf32> to vector<128x128xf32>
    %cst_71 = arith.constant dense<0.000000e+00> : vector<216x128xf32>
    %59 = tpu.matmul %56, %58, %cst_71 {dimension_numbers = #tpu.dot_dimension_numbers<[1], [0], [0], [1], [0, 0, 1, 1], [], []>} : vector<216x128xf32>, vector<128x128xf32>, vector<216x128xf32> -> vector<216x128xf32>
    %60 = arith.addf %54, %59 : vector<216x128xf32>
    %c0_72 = arith.constant 0 : index
    %c0_73 = arith.constant 0 : index
    %61 = vector.load %arg6[%c0_72, %c0_73] : memref<216x128xf32, #tpu.memory_space<vmem>>, vector<216x128xf32>
    tpu.vector_store %arg6[%c0_72, %c0_73], %60 {strides = array<i32>} : memref<216x128xf32, #tpu.memory_space<vmem>>, vector<216x128xf32>,
    %c0_74 = arith.constant 0 : index
    %c0_75 = arith.constant 0 : index
    %62 = vector.load %arg6[%c0_74, %c0_75] : memref<216x128xf32, #tpu.memory_space<vmem>>, vector<216x128xf32>
    %c0_76 = arith.constant 0 : index
    %c0_77 = arith.constant 0 : index
    %63 = vector.load %arg4[%c0_76, %c0_77] : memref<1x128xf32, #tpu.memory_space<vmem>>, vector<1x128xf32>
    %64 = vector.broadcast %63 : vector<1x128xf32> to vector<216x128xf32>
    %65 = arith.addf %62, %64 : vector<216x128xf32>
    %cst_78 = arith.constant 0.000000e+00 : f32
    %66 = vector.broadcast %cst_78 : f32 to vector<216x128xf32>
    %67 = arith.cmpf ogt, %65, %66 : vector<216x128xf32>
    %cst_79 = arith.constant 0.866426229 : f32
    %68 = vector.broadcast %cst_79 : f32 to vector<216x128xf32>
    %69 = arith.mulf %65, %68 : vector<216x128xf32>
    %70 = arith.select %67, %65, %69 : vector<216x128xi1>, vector<216x128xf32>
    %c0_80 = arith.constant 0 : index
    %c0_81 = arith.constant 0 : index
    %c0_82 = arith.constant 0 : index
    %71 = vector.load %arg5[%c0_80, %c0_81, %c0_82] : memref<1x216x128xf32, #tpu.memory_space<vmem>>, vector<1x216x128xf32>
    %72 = vector.shape_cast %71 : vector<1x216x128xf32> to vector<216x128xf32>
    %73 = vector.shape_cast %70 : vector<216x128xf32> to vector<1x216x128xf32>
    tpu.vector_store %arg5[%c0_80, %c0_81, %c0_82], %73 {strides = array<i32>} : memref<1x216x128xf32, #tpu.memory_space<vmem>>, vector<1x216x128xf32>,
    return
  }
  func.func @transform_0(%arg0: i32) -> (i32, i32, i32) {
    %c0_i32 = arith.constant 0 : i32
    %c0_i32_0 = arith.constant 0 : i32
    %c0_i32_1 = arith.constant 0 : i32
    return %arg0, %c0_i32, %c0_i32_0 : i32, i32, i32
  }
  func.func @transform_1(%arg0: i32) -> (i32, i32, i32) {
    %c0_i32 = arith.constant 0 : i32
    %c0_i32_0 = arith.constant 0 : i32
    %c0_i32_1 = arith.constant 0 : i32
    return %arg0, %c0_i32, %c0_i32_0 : i32, i32, i32
  }
  func.func @transform_2(%arg0: i32) -> (i32, i32, i32) {
    %c0_i32 = arith.constant 0 : i32
    %c0_i32_0 = arith.constant 0 : i32
    %c0_i32_1 = arith.constant 0 : i32
    %c0_i32_2 = arith.constant 0 : i32
    return %c0_i32, %c0_i32_0, %c0_i32_1 : i32, i32, i32
  }
  func.func @transform_3(%arg0: i32) -> (i32, i32) {
    %c0_i32 = arith.constant 0 : i32
    %c0_i32_0 = arith.constant 0 : i32
    %c0_i32_1 = arith.constant 0 : i32
    return %c0_i32, %c0_i32_0 : i32, i32
  }
  func.func @transform_4(%arg0: i32) -> (i32, i32, i32) {
    %c0_i32 = arith.constant 0 : i32
    %c0_i32_0 = arith.constant 0 : i32
    %c0_i32_1 = arith.constant 0 : i32
    return %arg0, %c0_i32, %c0_i32_0 : i32, i32, i32
  }
}

</mosaic_0001>

<bundles_post_ra>
// kernel: conv2d_leakyrelu.1
= control target key start
LH: loop header
LB: loop body
LE: loop exit
PB: predicated region body
PF: predicated region fallthrough
CT: control target
= control target key end

     0   :  { %s4611_s15 = smov 0   ;;  %s6262_s0 = inlined_call_operand.vmem [shape: f32[2,288,128], index: 0, kind: input, shape index: {}]   ;;  %s6263_s1 = inlined_call_operand.vmem [shape: f32[2,288,128], index: 1, kind: input, shape index: {}]   ;;  %s6264_s2 = inlined_call_operand.vmem [shape: f32[8,128,128], index: 2, kind: input, shape index: {}]   ;;  %s6265_s3 = inlined_call_operand.vmem [shape: f32[1,128], index: 3, kind: input, shape index: {}]   ;;  %s6266_s4 = inlined_call_operand.vmem [shape: f32[2,216,128], index: 4, kind: output, shape index: {}]  }
   0x1 LB: > { %s2999_s16 = sadd.s32 4294967295, %s4581_s15   ;;  %p3003_p0 = scmp.ge.s32.totalorder %s4581_s15, 1  ;;  %s4581_s15 = sphi %s4611_s15, %s14_s15  }
   0x2   : > { %p172_p1 = scmp.lt.s32.totalorder %s4581_s15, 3 }
   0x4   : > { %p173_p2 = pnand %p3003_p0, %p172_p1 }
   0x5   : > { %v245_v0 = vld [vmem:[%s6264_s2] sm:$0xff] (!%p173_p2)  ;;  %v246_v1 = vld [vmem:[%s6264_s2 + $0x8] sm:$0xff] (!%p173_p2)  ;;  %v4583_v3 = vmov (!%p173_p2), 0.0|0.0   ;;  %v247_v6 = vld [vmem:[%s6264_s2 + $0x10] sm:$0xff] (!%p173_p2)  ;;  %vm4584_vm0 = vmmov (!%p173_p2), 0   ;;  %v4585_v11 = vmov (!%p173_p2), 0.0  }
   0x6   : > { %176 = sbr.rel (%p173_p2) target bundleno = 689 (0x2b1), region = 36  ;;  %v3007_v2 = vld [vmem:[%s6264_s2 + $0x80] sm:$0xff] (!%p173_p2)  ;;  %4370 = vmatprep.subr.bf16.mxu0 (!%p173_p2), %v4583_v3  ;;  %v4371_v4 = vpack.c.bf16 (!%p173_p2), %v246_v1, %v245_v0  ;;  %4394 = vmatprep.subr.bf16.mxu1 (!%p173_p2), %v4583_v3  ;;  %v3008_v5 = vld [vmem:[%s6264_s2 + $0x88] sm:$0xff] (!%p173_p2)  ;;  %v248_v7 = vld [vmem:[%s6264_s2 + $0x18] sm:$0xff] (!%p173_p2)  ;;  %p203_p3 = scmp.lt.s32.totalorder (!%p173_p2), %s2999_s16, 1 }
   0x7   : > { %v4395_v8 = vpack.c.bf16 (!%p173_p2), %v3008_v5, %v3007_v2  ;;  %v3009_v9 = vld [vmem:[%s6264_s2 + $0x90] sm:$0xff] (!%p173_p2)  ;;  %v3010_v10 = vld [vmem:[%s6264_s2 + $0x98] sm:$0xff] (!%p173_p2)  ;;  %3498 = vmatprep.mubr.msk.f32.mxu0 (!%p173_p2), %vm4584_vm0, %v4585_v11  ;;  %3611 = vmatprep.mubr.msk.f32.mxu1 (!%p173_p2), %vm4584_vm0, %v4585_v11  ;;  %v4374_v12 = vpack.c.bf16 (!%p173_p2), %v248_v7, %v247_v6  ;;  %v249_v14 = vld [vmem:[%s6264_s2 + $0x20] sm:$0xff] (!%p173_p2) }
   0x8   : > { %4372 = vmatpush3.bf16.msra.mxu0 (!%p173_p2), %v4371_v4  ;;  %v4398_v13 = vpack.c.bf16 (!%p173_p2), %v3010_v10, %v3009_v9  ;;  %v250_v15 = vld [vmem:[%s6264_s2 + $0x28] sm:$0xff] (!%p173_p2)  ;;  %v3011_v16 = vld [vmem:[%s6264_s2 + $0xa0] sm:$0xff] (!%p173_p2)  ;;  %v251_v20 = vld [vmem:[%s6264_s2 + $0x30] sm:$0xff] (!%p173_p2) }
   0x9   : > { %4396 = vmatpush3.bf16.msra.mxu1 (!%p173_p2), %v4395_v8  ;;  %4373 = vmatprep.subr.bf16.mxu0 (!%p173_p2), %v4583_v3  ;;  %v3012_v17 = vld [vmem:[%s6264_s2 + $0xa8] sm:$0xff] (!%p173_p2)  ;;  %v4377_v18 = vpack.c.bf16 (!%p173_p2), %v250_v15, %v249_v14  ;;  %v252_v21 = vld [vmem:[%s6264_s2 + $0x38] sm:$0xff] (!%p173_p2)  ;;  %v3013_v22 = vld [vmem:[%s6264_s2 + $0xb0] sm:$0xff] (!%p173_p2) }
   0xa   : > { %4397 = vmatprep.subr.bf16.mxu1 (!%p173_p2), %v4583_v3  ;;  %v4401_v19 = vpack.c.bf16 (!%p173_p2), %v3012_v17, %v3011_v16  ;;  %v3014_v23 = vld [vmem:[%s6264_s2 + $0xb8] sm:$0xff] (!%p173_p2)  ;;  %v4380_v24 = vpack.c.bf16 (!%p173_p2), %v252_v21, %v251_v20  ;;  %v253_v26 = vld [vmem:[%s6264_s2 + $0x40] sm:$0xff] (!%p173_p2)  ;;  %v254_v27 = vld [vmem:[%s6264_s2 + $0x48] sm:$0xff] (!%p173_p2) }
   0xb   : > { %v4404_v25 = vpack.c.bf16 (!%p173_p2), %v3014_v23, %v3013_v22  ;;  %v3015_v28 = vld [vmem:[%s6264_s2 + $0xc0] sm:$0xff] (!%p173_p2)  ;;  %v3016_v29 = vld [vmem:[%s6264_s2 + $0xc8] sm:$0xff] (!%p173_p2)  ;;  %v4383_v30 = vpack.c.bf16 (!%p173_p2), %v254_v27, %v253_v26  ;;  %v255_v32 = vld [vmem:[%s6264_s2 + $0x50] sm:$0xff] (!%p173_p2) }
   0xc   : > { %4375 = vmatpush3.bf16.msra.mxu0 (!%p173_p2), %v4374_v12  ;;  %v4407_v31 = vpack.c.bf16 (!%p173_p2), %v3016_v29, %v3015_v28  ;;  %v256_v33 = vld [vmem:[%s6264_s2 + $0x58] sm:$0xff] (!%p173_p2)  ;;  %v3017_v34 = vld [vmem:[%s6264_s2 + $0xd0] sm:$0xff] (!%p173_p2)  ;;  %v257_v38 = vld [vmem:[%s6264_s2 + $0x60] sm:$0xff] (!%p173_p2) }
   0xd   : > { %4399 = vmatpush3.bf16.msra.mxu1 %v4398_v13  ;;  %4376 = vmatprep.subr.bf16.mxu0 %v4583_v3  ;;  %v3018_v35 = vld [vmem:[%s6264_s2 + $0xd8] sm:$0xff]  ;;  %v4386_v36 = vpack.c.bf16 %v256_v33, %v255_v32  ;;  %v258_v39 = vld [vmem:[%s6264_s2 + $0x68] sm:$0xff]  ;;  %s6268_s16 = smov (!%p203_p3, %s2999_s16), 1  ;;  %v3019_v40 = vld [vmem:[%s6264_s2 + $0xe0] sm:$0xff] }
   0xe   : > { %4400 = vmatprep.subr.bf16.mxu1 %v4583_v3  ;;  %v4410_v37 = vpack.c.bf16 %v3018_v35, %v3017_v34  ;;  %v3020_v41 = vld [vmem:[%s6264_s2 + $0xe8] sm:$0xff]  ;;  %v4389_v42 = vpack.c.bf16 %v258_v39, %v257_v38  ;;  %v259_v44 = vld [vmem:[%s6264_s2 + $0x70] sm:$0xff]  ;;  %v260_v45 = vld [vmem:[%s6264_s2 + $0x78] sm:$0xff]  ;;  %s4562_s29 = smul.u32 288, %s6268_s16 }
   0xf   : > { %v4413_v43 = vpack.c.bf16 %v3020_v41, %v3019_v40  ;;  %v3021_v46 = vld [vmem:[%s6264_s2 + $0xf0] sm:$0xff]  ;;  %v3022_v47 = vld [vmem:[%s6264_s2 + $0xf8] sm:$0xff]  ;;  %v4392_v48 = vpack.c.bf16 %v260_v45, %v259_v44  ;;  %v3023_v50 = vld [vmem:[%s6264_s2 + $0x100] sm:$0xff]  ;;  %s4563_s6 = smul.u32 216, %s6268_s16 }
  0x10   : > { %4378 = vmatpush3.bf16.msra.mxu0 %v4377_v18  ;;  %v4416_v49 = vpack.c.bf16 %v3022_v47, %v3021_v46  ;;  %s4744_s10 = scalar_lea.vmem %s6262_s0, %s4562_s29  ;;  %v3024_v51 = vld [vmem:[%s6264_s2 + $0x108] sm:$0xff]  ;;  %s4756_s19 = scalar_lea.vmem %s6263_s1, %s4562_s29  ;;  %v3039_v52 = vld [vmem:[%s6264_s2 + $0x180] sm:$0xff]  ;;  %v3025_v58 = vld [vmem:[%s6264_s2 + $0x110] sm:$0xff] }
  0x11   : > { %4402 = vmatpush3.bf16.msra.mxu1 %v4401_v19  ;;  %4379 = vmatprep.subr.bf16.mxu0 %v4583_v3  ;;  %v3040_v53 = vld [vmem:[%s6264_s2 + $0x188] sm:$0xff]  ;;  %v218_v54 = vld [vmem:[%s4744_s10] sm:$0xff]  ;;  %v4419_v55 = vpack.c.bf16 %v3024_v51, %v3023_v50  ;;  %v3026_v59 = vld [vmem:[%s6264_s2 + $0x118] sm:$0xff]  ;;  %s6179_s9 = scalar_lea.vmem %s6266_s4, %s4563_s6 }
  0x12   : > { %4403 = vmatprep.subr.bf16.mxu1 %v4583_v3  ;;  %v515_v56 = vld [vmem:[%s4756_s19] sm:$0xff]  ;;  %v4443_v57 = vpack.c.bf16 %v3040_v53, %v3039_v52  ;;  %v3041_v60 = vld [vmem:[%s6264_s2 + $0x190] sm:$0xff]  ;;  %v3042_v61 = vld [vmem:[%s6264_s2 + $0x198] sm:$0xff]  ;;  %v4422_v0 = vpack.c.bf16 %v3026_v59, %v3025_v58 }
  0x13   : > { %v219_v62 = vld [vmem:[%s4744_s10 + $0x8] sm:$0xff]  ;;  %v4446_v1 = vpack.c.bf16 %v3042_v61, %v3041_v60  ;;  %v3027_v2 = vld [vmem:[%s6264_s2 + $0x120] sm:$0xff]  ;;  %v220_v7 = vld [vmem:[%s4744_s10 + $0x10] sm:$0xff] }
  0x14   : > { %4381 = vmatpush3.bf16.msra.mxu0 %v4380_v24  ;;  %v516_v63 = vld [vmem:[%s4756_s19 + $0x8] sm:$0xff]  ;;  %v3043_v5 = vld [vmem:[%s6264_s2 + $0x1a0] sm:$0xff]  ;;  %v517_v8 = vld [vmem:[%s4756_s19 + $0x10] sm:$0xff] }
  0x15   : > { %4405 = vmatpush3.bf16.msra.mxu1 %v4404_v25  ;;  %4382 = vmatprep.subr.bf16.mxu0 %v4583_v3  ;;  %v3028_v4 = vld [vmem:[%s6264_s2 + $0x128] sm:$0xff]  ;;  %v3029_v12 = vld [vmem:[%s6264_s2 + $0x130] sm:$0xff]  ;;  %v3030_v13 = vld [vmem:[%s6264_s2 + $0x138] sm:$0xff] }
  0x16   : > { %4406 = vmatprep.subr.bf16.mxu1 %v4583_v3  ;;  %v3044_v6 = vld [vmem:[%s6264_s2 + $0x1a8] sm:$0xff]  ;;  %v4425_v9 = vpack.c.bf16 %v3028_v4, %v3027_v2  ;;  %v3045_v14 = vld [vmem:[%s6264_s2 + $0x1b0] sm:$0xff]  ;;  %v3046_v15 = vld [vmem:[%s6264_s2 + $0x1b8] sm:$0xff]  ;;  %v4428_v18 = vpack.c.bf16 %v3030_v13, %v3029_v12 }
  0x17   : > { %v4449_v10 = vpack.c.bf16 %v3044_v6, %v3043_v5  ;;  %v4823_v16 = vld [vmem:[%s4744_s10 + $0x18] sm:$0xff]  ;;  %v4452_v19 = vpack.c.bf16 %v3046_v15, %v3045_v14  ;;  %v3031_v20 = vld [vmem:[%s6264_s2 + $0x140] sm:$0xff]  ;;  %v3032_v21 = vld [vmem:[%s6264_s2 + $0x148] sm:$0xff] }
  0x18   : > { %4384 = vmatpush3.bf16.msra.mxu0 %v4383_v30  ;;  %v4828_v17 = vld [vmem:[%s4756_s19 + $0x18] sm:$0xff]  ;;  %v3047_v22 = vld [vmem:[%s6264_s2 + $0x1c0] sm:$0xff]  ;;  %v3048_v23 = vld [vmem:[%s6264_s2 + $0x1c8] sm:$0xff]  ;;  %v4431_v26 = vpack.c.bf16 %v3032_v21, %v3031_v20 }
  0x19   : > { %4408 = vmatpush3.bf16.msra.mxu1 %v4407_v31  ;;  %4385 = vmatprep.subr.bf16.mxu0 %v4583_v3  ;;  %v4849_v24 = vld [vmem:[%s4744_s10 + $0x20] sm:$0xff]  ;;  %v4455_v27 = vpack.c.bf16 %v3048_v23, %v3047_v22  ;;  %v3033_v28 = vld [vmem:[%s6264_s2 + $0x150] sm:$0xff]  ;;  %v3034_v29 = vld [vmem:[%s6264_s2 + $0x158] sm:$0xff] }
  0x1a   : > { %4409 = vmatprep.subr.bf16.mxu1 %v4583_v3  ;;  %v4854_v25 = vld [vmem:[%s4756_s19 + $0x20] sm:$0xff]  ;;  %v3049_v30 = vld [vmem:[%s6264_s2 + $0x1d0] sm:$0xff]  ;;  %v3050_v31 = vld [vmem:[%s6264_s2 + $0x1d8] sm:$0xff]  ;;  %v4434_v34 = vpack.c.bf16 %v3034_v29, %v3033_v28 }
  0x1b   : > { %v4875_v32 = vld [vmem:[%s4744_s10 + $0x28] sm:$0xff]  ;;  %v4458_v35 = vpack.c.bf16 %v3050_v31, %v3049_v30  ;;  %v3051_v38 = vld [vmem:[%s6264_s2 + $0x1e0] sm:$0xff]  ;;  %v4901_v40 = vld [vmem:[%s4744_s10 + $0x30] sm:$0xff] }
  0x1c   : > { %4387 = vmatpush3.bf16.msra.mxu0 %v4386_v36  ;;  %v4880_v33 = vld [vmem:[%s4756_s19 + $0x28] sm:$0xff]  ;;  %v3035_v36 = vld [vmem:[%s6264_s2 + $0x160] sm:$0xff]  ;;  %v4906_v41 = vld [vmem:[%s4756_s19 + $0x30] sm:$0xff] }
  0x1d   : > { %4411 = vmatpush3.bf16.msra.mxu1 %v4410_v37  ;;  %4388 = vmatprep.subr.bf16.mxu0 %v4583_v3  ;;  %v3036_v37 = vld [vmem:[%s6264_s2 + $0x168] sm:$0xff]  ;;  %v3037_v44 = vld [vmem:[%s6264_s2 + $0x170] sm:$0xff]  ;;  %v3038_v45 = vld [vmem:[%s6264_s2 + $0x178] sm:$0xff] }
  0x1e   : > { %4412 = vmatprep.subr.bf16.mxu1 %v4583_v3  ;;  %v3052_v39 = vld [vmem:[%s6264_s2 + $0x1e8] sm:$0xff]  ;;  %v3053_v46 = vld [vmem:[%s6264_s2 + $0x1f0] sm:$0xff]  ;;  %v3054_v47 = vld [vmem:[%s6264_s2 + $0x1f8] sm:$0xff]  ;;  %v4440_v50 = vpack.c.bf16 %v3038_v45, %v3037_v44 }
  0x1f   : > { %v4464_v51 = vpack.c.bf16 %v3054_v47, %v3053_v46  ;;  %v4941_v52 = vld [vmem:[%s4744_s10 + $0x40] sm:$0xff]  ;;  %v4979_v58 = vld [vmem:[%s4744_s10 + $0x58] sm:$0xff]  ;;  %v5111_v20 = vld [vmem:[%s4744_s10 + $0xb0] sm:$0xff] }
  0x20   : > { %4390 = vmatpush3.bf16.msra.mxu0 %v4389_v42  ;;  %v4437_v42 = vpack.c.bf16 %v3036_v37, %v3035_v36  ;;  %v4946_v53 = vld [vmem:[%s4756_s19 + $0x40] sm:$0xff]  ;;  %v4984_v59 = vld [vmem:[%s4756_s19 + $0x58] sm:$0xff]  ;;  %v5116_v21 = vld [vmem:[%s4756_s19 + $0xb0] sm:$0xff] }
  0x21   : > { %4414 = vmatpush3.bf16.msra.mxu1 %v4413_v43  ;;  %4391 = vmatprep.subr.bf16.mxu0 %v4583_v3  ;;  %v4461_v43 = vpack.c.bf16 %v3052_v39, %v3051_v38  ;;  %v4991_v60 = vld [vmem:[%s4744_s10 + $0x60] sm:$0xff]  ;;  %v5027_v2 = vld [vmem:[%s4744_s10 + $0x78] sm:$0xff]  ;;  %v5147_v28 = vld [vmem:[%s4744_s10 + $0xc8] sm:$0xff] }
  0x22   : > { %4415 = vmatprep.subr.bf16.mxu1 %v4583_v3  ;;  %v4996_v61 = vld [vmem:[%s4756_s19 + $0x60] sm:$0xff]  ;;  %v5032_v4 = vld [vmem:[%s4756_s19 + $0x78] sm:$0xff]  ;;  %v5152_v29 = vld [vmem:[%s4756_s19 + $0xc8] sm:$0xff] }
  0x23   : > { %v5039_v5 = vld [vmem:[%s4744_s10 + $0x80] sm:$0xff]  ;;  %v5075_v12 = vld [vmem:[%s4744_s10 + $0x98] sm:$0xff]  ;;  %v5159_v30 = vld [vmem:[%s4744_s10 + $0xd0] sm:$0xff] }
  0x24   : > { %4393 = vmatpush3.bf16.msra.mxu0 %v4392_v48  ;;  %v4927_v48 = vld [vmem:[%s4744_s10 + $0x38] sm:$0xff]  ;;  %v5044_v6 = vld [vmem:[%s4756_s19 + $0x80] sm:$0xff]  ;;  %v5164_v31 = vld [vmem:[%s4756_s19 + $0xd0] sm:$0xff] }
  0x25   : > { %4417 = vmatpush3.bf16.msra.mxu1 %v4416_v49  ;;  %4418 = vmatprep.subr.bf16.mxu0 %v4583_v3  ;;  %v4932_v49 = vld [vmem:[%s4756_s19 + $0x38] sm:$0xff]  ;;  %v5087_v14 = vld [vmem:[%s4744_s10 + $0xa0] sm:$0xff]  ;;  %v3072_v37 = vld [vmem:[%s6264_s2 + $0x288] sm:$0xff] }
  0x26   : > { %4442 = vmatprep.subr.bf16.mxu1 %v4583_v3  ;;  %v5080_v13 = vld [vmem:[%s4756_s19 + $0x98] sm:$0xff]  ;;  %v5092_v15 = vld [vmem:[%s4756_s19 + $0xa0] sm:$0xff]  ;;  %v3073_v44 = vld [vmem:[%s6264_s2 + $0x290] sm:$0xff] }
  0x27   : > { %3499 = vmatmul.mubr.f32.vlgmr.msra.gmra.mrb[0].mxu0 %v218_v54  ;;  %v4955_v54 = vld [vmem:[%s4744_s10 + $0x48] sm:$0xff]  ;;  %v5123_v22 = vld [vmem:[%s4744_s10 + $0xb8] sm:$0xff]  ;;  %v3071_v36 = vld [vmem:[%s6264_s2 + $0x280] sm:$0xff] }
  0x28   : > { %3612 = vmatmul.mubr.f32.vlgmr.msra.gmra.mrb[0].mxu1 %v515_v56  ;;  %4420 = vmatpush3.bf16.msra.mxu0 %v4419_v55  ;;  %v4960_v55 = vld [vmem:[%s4756_s19 + $0x48] sm:$0xff]  ;;  %v4967_v56 = vld [vmem:[%s4744_s10 + $0x50] sm:$0xff]  ;;  %v5128_v23 = vld [vmem:[%s4756_s19 + $0xb8] sm:$0xff]  ;;  %v4491_v39 = vpack.c.bf16 %v3072_v37, %v3071_v36 }
  0x29   : > { %3501 = vmatprep.mubr.msk.f32.mxu0 %vm4584_vm0, %v4585_v11  ;;  %4444 = vmatpush3.bf16.msra.mxu1 %v4443_v57  ;;  %v4972_v57 = vld [vmem:[%s4756_s19 + $0x50] sm:$0xff]  ;;  %v3074_v45 = vld [vmem:[%s6264_s2 + $0x298] sm:$0xff]  ;;  %v3059_v47 = vld [vmem:[%s6264_s2 + $0x220] sm:$0xff] }
  0x2a   : > { %3614 = vmatprep.mubr.msk.f32.mxu1 %vm4584_vm0, %v4585_v11  ;;  %4421 = vmatprep.subr.bf16.mxu0 %v4583_v3  ;;  %v3077_v36 = vld [vmem:[%s6264_s2 + $0x2b0] sm:$0xff]  ;;  %v3078_v37 = vld [vmem:[%s6264_s2 + $0x2b8] sm:$0xff] }
  0x2b   : > { %3502 = vmatmul.mubr.f32.gmra.mrb[2].mxu0 %v219_v62  ;;  %4445 = vmatprep.subr.bf16.mxu1 %v4583_v3  ;;  %v5003_v62 = vld [vmem:[%s4744_s10 + $0x68] sm:$0xff] }
  0x2c   : > { %3615 = vmatmul.mubr.f32.gmra.mrb[2].mxu1 %v516_v63  ;;  %3504 = vmatprep.mubr.msk.f32.mxu0 %vm4584_vm0, %v4585_v11  ;;  %v5008_v63 = vld [vmem:[%s4756_s19 + $0x68] sm:$0xff] }
  0x2d   : > { %3617 = vmatprep.mubr.msk.f32.mxu1 %vm4584_vm0, %v4585_v11  ;;  %4423 = vmatpush3.bf16.msra.mxu0 %v4422_v0  ;;  %v5015_v0 = vld [vmem:[%s4744_s10 + $0x70] sm:$0xff] }
  0x2e   : > { %4447 = vmatpush3.bf16.msra.mxu1 %v4446_v1  ;;  %4424 = vmatprep.subr.bf16.mxu0 %v4583_v3  ;;  %v5020_v1 = vld [vmem:[%s4756_s19 + $0x70] sm:$0xff] }
  0x2f   : > { %3505 = vmatmul.mubr.f32.gmra.mrb[4].mxu0 %v220_v7  ;;  %4448 = vmatprep.subr.bf16.mxu1 %v4583_v3  ;;  %v5051_v7 = vld [vmem:[%s4744_s10 + $0x88] sm:$0xff] }
  0x30   : > { %3618 = vmatmul.mubr.f32.gmra.mrb[4].mxu1 %v517_v8  ;;  %3507 = vmatprep.mubr.msk.f32.mxu0 %vm4584_vm0, %v4585_v11  ;;  %v5056_v8 = vld [vmem:[%s4756_s19 + $0x88] sm:$0xff] }
  0x31   : > { %3620 = vmatprep.mubr.msk.f32.mxu1 %vm4584_vm0, %v4585_v11  ;;  %4426 = vmatpush3.bf16.msra.mxu0 %v4425_v9  ;;  %v5063_v9 = vld [vmem:[%s4744_s10 + $0x90] sm:$0xff] }
  0x32   : > { %4450 = vmatpush3.bf16.msra.mxu1 %v4449_v10  ;;  %4427 = vmatprep.subr.bf16.mxu0 %v4583_v3  ;;  %v5068_v10 = vld [vmem:[%s4756_s19 + $0x90] sm:$0xff] }
  0x33   : > { %3508 = vmatmul.mubr.f32.gmra.mrb[6].mxu0 %v4823_v16  ;;  %4451 = vmatprep.subr.bf16.mxu1 %v4583_v3 }
  0x34   : > { %3621 = vmatmul.mubr.f32.gmra.mrb[6].mxu1 %v4828_v17  ;;  %3510 = vmatprep.mubr.msk.f32.mxu0 %vm4584_vm0, %v4585_v11 }
  0x35   : > { %3623 = vmatprep.mubr.msk.f32.mxu1 %vm4584_vm0, %v4585_v11  ;;  %4429 = vmatpush3.bf16.msra.mxu0 %v4428_v18  ;;  %v5099_v18 = vld [vmem:[%s4744_s10 + $0xa8] sm:$0xff] }
  0x36   : > { %4453 = vmatpush3.bf16.msra.mxu1 %v4452_v19  ;;  %4430 = vmatprep.subr.bf16.mxu0 %v4583_v3  ;;  %v5104_v19 = vld [vmem:[%s4756_s19 + $0xa8] sm:$0xff] }
  0x37   : > { %3511 = vmatmul.mubr.f32.gmra.mrb[8].mxu0 %v4849_v24  ;;  %4454 = vmatprep.subr.bf16.mxu1 %v4583_v3 }
  0x38   : > { %3624 = vmatmul.mubr.f32.gmra.mrb[8].mxu1 %v4854_v25  ;;  %3513 = vmatprep.mubr.msk.f32.mxu0 %vm4584_vm0, %v4585_v11 }
  0x39   : > { %3626 = vmatprep.mubr.msk.f32.mxu1 %vm4584_vm0, %v4585_v11  ;;  %4432 = vmatpush3.bf16.msra.mxu0 %v4431_v26  ;;  %v5135_v26 = vld [vmem:[%s4744_s10 + $0xc0] sm:$0xff] }
  0x3a   : > { %4456 = vmatpush3.bf16.msra.mxu1 %v4455_v27  ;;  %4433 = vmatprep.subr.bf16.mxu0 %v4583_v3  ;;  %v5140_v27 = vld [vmem:[%s4756_s19 + $0xc0] sm:$0xff] }
  0x3b   : > { %3514 = vmatmul.mubr.f32.gmra.mrb[10].mxu0 %v4875_v32  ;;  %4457 = vmatprep.subr.bf16.mxu1 %v4583_v3 }
  0x3c   : > { %3627 = vmatmul.mubr.f32.gmra.mrb[10].mxu1 %v4880_v33  ;;  %3516 = vmatprep.mubr.msk.f32.mxu0 %vm4584_vm0, %v4585_v11 }
  0x3d   : > { %3629 = vmatprep.mubr.msk.f32.mxu1 %vm4584_vm0, %v4585_v11  ;;  %4435 = vmatpush3.bf16.msra.mxu0 %v4434_v34  ;;  %v3055_v34 = vld [vmem:[%s6264_s2 + $0x200] sm:$0xff] }
  0x3e   : > { %4459 = vmatpush3.bf16.msra.mxu1 %v4458_v35  ;;  %4436 = vmatprep.subr.bf16.mxu0 %v4583_v3  ;;  %v3056_v35 = vld [vmem:[%s6264_s2 + $0x208] sm:$0xff] }
  0x3f   : > { %3517 = vmatmul.mubr.f32.gmra.mrb[12].mxu0 %v4901_v40  ;;  %4460 = vmatprep.subr.bf16.mxu1 %v4583_v3  ;;  %v4467_v38 = vpack.c.bf16 %v3056_v35, %v3055_v34  ;;  %v3061_v35 = vld [vmem:[%s6264_s2 + $0x230] sm:$0xff] }
  0x40   : > { %3630 = vmatmul.mubr.f32.gmra.mrb[12].mxu1 %v4906_v41  ;;  %3519 = vmatprep.mubr.msk.f32.mxu0 %vm4584_vm0, %v4585_v11 }
  0x41   : > { %3632 = vmatprep.mubr.msk.f32.mxu1 %vm4584_vm0, %v4585_v11  ;;  %4438 = vmatpush3.bf16.msra.mxu0 %v4437_v42  ;;  %v3057_v42 = vld [vmem:[%s6264_s2 + $0x210] sm:$0xff] }
  0x42   : > { %4462 = vmatpush3.bf16.msra.mxu1 %v4461_v43  ;;  %4439 = vmatprep.subr.bf16.mxu0 %v4583_v3  ;;  %v3058_v43 = vld [vmem:[%s6264_s2 + $0x218] sm:$0xff] }
  0x43   : > { %3520 = vmatmul.mubr.f32.gmra.mrb[14].mxu0 %v4927_v48  ;;  %4463 = vmatprep.subr.bf16.mxu1 %v4583_v3  ;;  %v4470_v46 = vpack.c.bf16 %v3058_v43, %v3057_v42  ;;  %v3079_v42 = vld [vmem:[%s6264_s2 + $0x2c0] sm:$0xff]  ;;  %v3080_v43 = vld [vmem:[%s6264_s2 + $0x2c8] sm:$0xff] }
  0x44   : > { %3633 = vmatmul.mubr.f32.gmra.mrb[14].mxu1 %v4932_v49  ;;  %3522 = vmatprep.mubr.msk.f32.mxu0 %vm4584_vm0, %v4585_v11 }
  0x45   : > { %3635 = vmatprep.mubr.msk.f32.mxu1 %vm4584_vm0, %v4585_v11  ;;  %4441 = vmatpush3.bf16.msra.mxu0 %v4440_v50  ;;  %v3060_v50 = vld [vmem:[%s6264_s2 + $0x228] sm:$0xff] }
  0x46   : > { %4465 = vmatpush3.bf16.msra.mxu1 %v4464_v51  ;;  %4466 = vmatprep.subr.bf16.mxu0 %v4583_v3  ;;  %v3076_v51 = vld [vmem:[%s6264_s2 + $0x2a8] sm:$0xff] }
  0x47   : > { %3523 = vmatmul.mubr.f32.gmra.mrb[16].mxu0 %v4941_v52  ;;  %4490 = vmatprep.subr.bf16.mxu1 %v4583_v3 }
  0x48   : > { %3636 = vmatmul.mubr.f32.gmra.mrb[16].mxu1 %v4946_v53  ;;  %3525 = vmatprep.mubr.msk.f32.mxu0 %vm4584_vm0, %v4585_v11 }
  0x49   : > { %3638 = vmatprep.mubr.msk.f32.mxu1 %vm4584_vm0, %v4585_v11 }
  0x4b   : > { %3526 = vmatmul.mubr.f32.gmra.mrb[18].mxu0 %v4955_v54 }
  0x4c   : > { %3639 = vmatmul.mubr.f32.gmra.mrb[18].mxu1 %v4960_v55  ;;  %3528 = vmatprep.mubr.msk.f32.mxu0 %vm4584_vm0, %v4585_v11 }
  0x4d   : > { %3641 = vmatprep.mubr.msk.f32.mxu1 %vm4584_vm0, %v4585_v11 }
  0x4f   : > { %3529 = vmatmul.mubr.f32.gmra.mrb[20].mxu0 %v4967_v56 }
  0x50   : > { %3642 = vmatmul.mubr.f32.gmra.mrb[20].mxu1 %v4972_v57  ;;  %3531 = vmatprep.mubr.msk.f32.mxu0 %vm4584_vm0, %v4585_v11 }
  0x51   : > { %3644 = vmatprep.mubr.msk.f32.mxu1 %vm4584_vm0, %v4585_v11 }
  0x53   : > { %3532 = vmatmul.mubr.f32.gmra.mrb[22].mxu0 %v4979_v58 }
  0x54   : > { %3645 = vmatmul.mubr.f32.gmra.mrb[22].mxu1 %v4984_v59  ;;  %3534 = vmatprep.mubr.msk.f32.mxu0 %vm4584_vm0, %v4585_v11 }
  0x55   : > { %3647 = vmatprep.mubr.msk.f32.mxu1 %vm4584_vm0, %v4585_v11 }
  0x57   : > { %3535 = vmatmul.mubr.f32.gmra.mrb[24].mxu0 %v4991_v60 }
  0x58   : > { %3648 = vmatmul.mubr.f32.gmra.mrb[24].mxu1 %v4996_v61  ;;  %3537 = vmatprep.mubr.msk.f32.mxu0 %vm4584_vm0, %v4585_v11 }
  0x59   : > { %3650 = vmatprep.mubr.msk.f32.mxu1 %vm4584_vm0, %v4585_v11 }
  0x5b   : > { %3538 = vmatmul.mubr.f32.gmra.mrb[26].mxu0 %v5003_v62 }
  0x5c   : > { %3651 = vmatmul.mubr.f32.gmra.mrb[26].mxu1 %v5008_v63  ;;  %3540 = vmatprep.mubr.msk.f32.mxu0 %vm4584_vm0, %v4585_v11 }
  0x5d   : > { %3653 = vmatprep.mubr.msk.f32.mxu1 %vm4584_vm0, %v4585_v11 }
  0x5f   : > { %3541 = vmatmul.mubr.f32.gmra.mrb[28].mxu0 %v5015_v0 }
  0x60   : > { %3654 = vmatmul.mubr.f32.gmra.mrb[28].mxu1 %v5020_v1  ;;  %3543 = vmatprep.mubr.msk.f32.mxu0 %vm4584_vm0, %v4585_v11 }
  0x61   : > { %3656 = vmatprep.mubr.msk.f32.mxu1 %vm4584_vm0, %v4585_v11 }
  0x63   : > { %3544 = vmatmul.mubr.f32.gmra.mrb[30].mxu0 %v5027_v2 }
  0x64   : > { %3657 = vmatmul.mubr.f32.gmra.mrb[30].mxu1 %v5032_v4  ;;  %3546 = vmatprep.mubr.msk.f32.mxu0 %vm4584_vm0, %v4585_v11 }
  0x65   : > { %3659 = vmatprep.mubr.msk.f32.mxu1 %vm4584_vm0, %v4585_v11 }
  0x67   : > { %3547 = vmatmul.mubr.f32.gmra.mrb[32].mxu0 %v5039_v5 }
  0x68   : > { %3660 = vmatmul.mubr.f32.gmra.mrb[32].mxu1 %v5044_v6  ;;  %3549 = vmatprep.mubr.msk.f32.mxu0 %vm4584_vm0, %v4585_v11 }
  0x69   : > { %3662 = vmatprep.mubr.msk.f32.mxu1 %vm4584_vm0, %v4585_v11 }
  0x6b   : > { %3550 = vmatmul.mubr.f32.gmra.mrb[34].mxu0 %v5051_v7 }
  0x6c   : > { %3663 = vmatmul.mubr.f32.gmra.mrb[34].mxu1 %v5056_v8  ;;  %3552 = vmatprep.mubr.msk.f32.mxu0 %vm4584_vm0, %v4585_v11 }
  0x6d   : > { %3665 = vmatprep.mubr.msk.f32.mxu1 %vm4584_vm0, %v4585_v11 }
  0x6f   : > { %3553 = vmatmul.mubr.f32.gmra.mrb[36].mxu0 %v5063_v9 }
  0x70   : > { %3666 = vmatmul.mubr.f32.gmra.mrb[36].mxu1 %v5068_v10  ;;  %3555 = vmatprep.mubr.msk.f32.mxu0 %vm4584_vm0, %v4585_v11 }
  0x71   : > { %3668 = vmatprep.mubr.msk.f32.mxu1 %vm4584_vm0, %v4585_v11 }
  0x73   : > { %3556 = vmatmul.mubr.f32.gmra.mrb[38].mxu0 %v5075_v12 }
  0x74   : > { %3669 = vmatmul.mubr.f32.gmra.mrb[38].mxu1 %v5080_v13  ;;  %3558 = vmatprep.mubr.msk.f32.mxu0 %vm4584_vm0, %v4585_v11 }
  0x75   : > { %3671 = vmatprep.mubr.msk.f32.mxu1 %vm4584_vm0, %v4585_v11 }
  0x77   : > { %3559 = vmatmul.mubr.f32.gmra.mrb[40].mxu0 %v5087_v14 }
  0x78   : > { %3672 = vmatmul.mubr.f32.gmra.mrb[40].mxu1 %v5092_v15  ;;  %3561 = vmatprep.mubr.msk.f32.mxu0 %vm4584_vm0, %v4585_v11 }
  0x79   : > { %3674 = vmatprep.mubr.msk.f32.mxu1 %vm4584_vm0, %v4585_v11 }
  0x7b   : > { %3562 = vmatmul.mubr.f32.gmra.mrb[42].mxu0 %v5099_v18 }
  0x7c   : > { %3675 = vmatmul.mubr.f32.gmra.mrb[42].mxu1 %v5104_v19  ;;  %3564 = vmatprep.mubr.msk.f32.mxu0 %vm4584_vm0, %v4585_v11 }
  0x7d   : > { %3677 = vmatprep.mubr.msk.f32.mxu1 %vm4584_vm0, %v4585_v11 }
  0x7f   : > { %3565 = vmatmul.mubr.f32.gmra.mrb[44].mxu0 %v5111_v20 }
  0x80   : > { %3678 = vmatmul.mubr.f32.gmra.mrb[44].mxu1 %v5116_v21  ;;  %3567 = vmatprep.mubr.msk.f32.mxu0 %vm4584_vm0, %v4585_v11 }
  0x81   : > { %3680 = vmatprep.mubr.msk.f32.mxu1 %vm4584_vm0, %v4585_v11 }
  0x83   : > { %3568 = vmatmul.mubr.f32.gmra.mrb[46].mxu0 %v5123_v22 }
  0x84   : > { %3681 = vmatmul.mubr.f32.gmra.mrb[46].mxu1 %v5128_v23  ;;  %3570 = vmatprep.mubr.msk.f32.mxu0 %vm4584_vm0, %v4585_v11 }
  0x85   : > { %3683 = vmatprep.mubr.msk.f32.mxu1 %vm4584_vm0, %v4585_v11 }
  0x87   : > { %3571 = vmatmul.mubr.f32.gmra.mrb[48].mxu0 %v5135_v26 }
  0x88   : > { %3684 = vmatmul.mubr.f32.gmra.mrb[48].mxu1 %v5140_v27  ;;  %3573 = vmatprep.mubr.msk.f32.mxu0 %vm4584_vm0, %v4585_v11 }
  0x89   : > { %3686 = vmatprep.mubr.msk.f32.mxu1 %vm4584_vm0, %v4585_v11 }
  0x8b   : > { %3574 = vmatmul.mubr.f32.gmra.mrb[50].mxu0 %v5147_v28 }
  0x8c   : > { %3687 = vmatmul.mubr.f32.gmra.mrb[50].mxu1 %v5152_v29  ;;  %3576 = vmatprep.mubr.msk.f32.mxu0 %vm4584_vm0, %v4585_v11 }
  0x8d   : > { %3689 = vmatprep.mubr.msk.f32.mxu1 %vm4584_vm0, %v4585_v11 }
  0x8f   : > { %3577 = vmatmul.mubr.f32.gmra.mrb[52].mxu0 %v5159_v30 }
  0x90   : > { %3690 = vmatmul.mubr.f32.gmra.mrb[52].mxu1 %v5164_v31  ;;  %3724 = vmatprep.mubr.msk.f32.mxu0 %vm4584_vm0, %v4585_v11 }
  0x91   : > { %3837 = vmatprep.mubr.msk.f32.mxu1 %vm4584_vm0, %v4585_v11 }
  0x93   : > { %3725 = vmatmul.mubr.f32.vlgmr.msra.gmra.mrb[54].mxu0 %v4823_v16  ;;  %v4494_v16 = vpack.c.bf16 %v3074_v45, %v3073_v44  ;;  %v4503_v45 = vpack.c.bf16 %v3080_v43, %v3079_v42 }
  0x94   : > { %4468 = vmatpush3.bf16.msra.mxu0 %v4467_v38  ;;  %3838 = vmatmul.mubr.f32.vlgmr.msra.gmra.mrb[54].mxu1 %v4828_v17  ;;  %v3075_v17 = vld [vmem:[%s6264_s2 + $0x2a0] sm:$0xff]  ;;  %v4500_v38 = vpack.c.bf16 %v3078_v37, %v3077_v36 }
  0x95   : > { %3727 = vmatprep.mubr.msk.f32.mxu0 %vm4584_vm0, %v4585_v11  ;;  %4492 = vmatpush3.bf16.msra.mxu1 %v4491_v39  ;;  %v4497_v34 = vpack.c.bf16 %v3076_v51, %v3075_v17  ;;  %v3063_v39 = vld [vmem:[%s6264_s2 + $0x240] sm:$0xff] }
  0x96   : > { %3840 = vmatprep.mubr.msk.f32.mxu1 %vm4584_vm0, %v4585_v11  ;;  %4469 = vmatprep.subr.bf16.mxu0 %v4583_v3 }
  0x97   : > { %3728 = vmatmul.mubr.f32.gmra.mrb[56].mxu0 %v4849_v24  ;;  %4493 = vmatprep.subr.bf16.mxu1 %v4583_v3  ;;  %v4473_v24 = vpack.c.bf16 %v3060_v50, %v3059_v47  ;;  %v3081_v47 = vld [vmem:[%s6264_s2 + $0x2d0] sm:$0xff]  ;;  %v3082_v50 = vld [vmem:[%s6264_s2 + $0x2d8] sm:$0xff] }
  0x98   : > { %3841 = vmatmul.mubr.f32.gmra.mrb[56].mxu1 %v4854_v25  ;;  %3730 = vmatprep.mubr.msk.f32.mxu0 %vm4584_vm0, %v4585_v11  ;;  %v3062_v25 = vld [vmem:[%s6264_s2 + $0x238] sm:$0xff]  ;;  %v4506_v51 = vpack.c.bf16 %v3082_v50, %v3081_v47  ;;  %v3089_v50 = vld [vmem:[%s6264_s2 + $0x310] sm:$0xff] }
  0x99   : > { %3843 = vmatprep.mubr.msk.f32.mxu1 %vm4584_vm0, %v4585_v11  ;;  %4471 = vmatpush3.bf16.msra.mxu0 %v4470_v46  ;;  %v3065_v46 = vld [vmem:[%s6264_s2 + $0x250] sm:$0xff] }
  0x9a   : > { %4495 = vmatpush3.bf16.msra.mxu1 %v4494_v16  ;;  %4472 = vmatprep.subr.bf16.mxu0 %v4583_v3  ;;  %v3066_v16 = vld [vmem:[%s6264_s2 + $0x258] sm:$0xff] }
  0x9b   : > { %3731 = vmatmul.mubr.f32.gmra.mrb[58].mxu0 %v4875_v32  ;;  %4496 = vmatprep.subr.bf16.mxu1 %v4583_v3  ;;  %v4476_v32 = vpack.c.bf16 %v3062_v25, %v3061_v35  ;;  %v4482_v17 = vpack.c.bf16 %v3066_v16, %v3065_v46  ;;  %v3083_v35 = vld [vmem:[%s6264_s2 + $0x2e0] sm:$0xff]  ;;  %v3084_v25 = vld [vmem:[%s6264_s2 + $0x2e8] sm:$0xff] }
  0x9c   : > { %3844 = vmatmul.mubr.f32.gmra.mrb[58].mxu1 %v4880_v33  ;;  %3733 = vmatprep.mubr.msk.f32.mxu0 %vm4584_vm0, %v4585_v11  ;;  %v3064_v33 = vld [vmem:[%s6264_s2 + $0x248] sm:$0xff]  ;;  %v4509_v37 = vpack.c.bf16 %v3084_v25, %v3083_v35  ;;  %v3106_v35 = vld [vmem:[%s6264_s2 + $0x398] sm:$0xff] }
  0x9d   : > { %3846 = vmatprep.mubr.msk.f32.mxu1 %vm4584_vm0, %v4585_v11  ;;  %4474 = vmatpush3.bf16.msra.mxu0 %v4473_v24  ;;  %v4479_v44 = vpack.c.bf16 %v3064_v33, %v3063_v39  ;;  %v3067_v24 = vld [vmem:[%s6264_s2 + $0x260] sm:$0xff]  ;;  %v3085_v39 = vld [vmem:[%s6264_s2 + $0x2f0] sm:$0xff]  ;;  %v3086_v33 = vld [vmem:[%s6264_s2 + $0x2f8] sm:$0xff] }
  0x9e   : > { %4498 = vmatpush3.bf16.msra.mxu1 %v4497_v34  ;;  %4475 = vmatprep.subr.bf16.mxu0 %v4583_v3  ;;  %v3068_v34 = vld [vmem:[%s6264_s2 + $0x268] sm:$0xff]  ;;  %v4512_v43 = vpack.c.bf16 %v3086_v33, %v3085_v39 }
  0x9f   : > { %3734 = vmatmul.mubr.f32.gmra.mrb[60].mxu0 %v4901_v40  ;;  %4499 = vmatprep.subr.bf16.mxu1 %v4583_v3  ;;  %v4485_v36 = vpack.c.bf16 %v3068_v34, %v3067_v24  ;;  %v3105_v34 = vld [vmem:[%s6264_s2 + $0x390] sm:$0xff] }
  0xa0   : > { %3847 = vmatmul.mubr.f32.gmra.mrb[60].mxu1 %v4906_v41  ;;  %3736 = vmatprep.mubr.msk.f32.mxu0 %vm4584_vm0, %v4585_v11 }
  0xa1   : > { %3849 = vmatprep.mubr.msk.f32.mxu1 %vm4584_vm0, %v4585_v11  ;;  %4477 = vmatpush3.bf16.msra.mxu0 %v4476_v32  ;;  %v3069_v32 = vld [vmem:[%s6264_s2 + $0x270] sm:$0xff] }
  0xa2   : > { %4501 = vmatpush3.bf16.msra.mxu1 %v4500_v38  ;;  %4478 = vmatprep.subr.bf16.mxu0 %v4583_v3  ;;  %v3070_v38 = vld [vmem:[%s6264_s2 + $0x278] sm:$0xff] }
  0xa3   : > { %3737 = vmatmul.mubr.f32.gmra.mrb[62].mxu0 %v4927_v48  ;;  %4502 = vmatprep.subr.bf16.mxu1 %v4583_v3  ;;  %v4488_v42 = vpack.c.bf16 %v3070_v38, %v3069_v32  ;;  %v4542_v32 = vpack.c.bf16 %v3106_v35, %v3105_v34  ;;  %v3091_v38 = vld [vmem:[%s6264_s2 + $0x320] sm:$0xff] }
  0xa4   : > { %3850 = vmatmul.mubr.f32.gmra.mrb[62].mxu1 %v4932_v49  ;;  %3739 = vmatprep.mubr.msk.f32.mxu0 %vm4584_vm0, %v4585_v11  ;;  %v3111_v35 = vld [vmem:[%s6264_s2 + $0x3c0] sm:$0xff] }
  0xa5   : > { %3852 = vmatprep.mubr.msk.f32.mxu1 %vm4584_vm0, %v4585_v11  ;;  %4480 = vmatpush3.bf16.msra.mxu0 %v4479_v44 }
  0xa6   : > { %4504 = vmatpush3.bf16.msra.mxu1 %v4503_v45  ;;  %4481 = vmatprep.subr.bf16.mxu0 %v4583_v3 }
  0xa7   : > { %3740 = vmatmul.mubr.f32.gmra.mrb[64].mxu0 %v4941_v52  ;;  %4505 = vmatprep.subr.bf16.mxu1 %v4583_v3 }
  0xa8   : > { %3853 = vmatmul.mubr.f32.gmra.mrb[64].mxu1 %v4946_v53  ;;  %3742 = vmatprep.mubr.msk.f32.mxu0 %vm4584_vm0, %v4585_v11 }
  0xa9   : > { %3855 = vmatprep.mubr.msk.f32.mxu1 %vm4584_vm0, %v4585_v11  ;;  %4483 = vmatpush3.bf16.msra.mxu0 %v4482_v17  ;;  %v3090_v17 = vld [vmem:[%s6264_s2 + $0x318] sm:$0xff] }
  0xaa   : > { %4507 = vmatpush3.bf16.msra.mxu1 %v4506_v51  ;;  %4484 = vmatprep.subr.bf16.mxu0 %v4583_v3 }
  0xab   : > { %3743 = vmatmul.mubr.f32.gmra.mrb[66].mxu0 %v4955_v54  ;;  %4508 = vmatprep.subr.bf16.mxu1 %v4583_v3 }
  0xac   : > { %3856 = vmatmul.mubr.f32.gmra.mrb[66].mxu1 %v4960_v55  ;;  %3745 = vmatprep.mubr.msk.f32.mxu0 %vm4584_vm0, %v4585_v11 }
  0xad   : > { %3858 = vmatprep.mubr.msk.f32.mxu1 %vm4584_vm0, %v4585_v11  ;;  %4486 = vmatpush3.bf16.msra.mxu0 %v4485_v36 }
  0xae   : > { %4510 = vmatpush3.bf16.msra.mxu1 %v4509_v37  ;;  %4487 = vmatprep.subr.bf16.mxu0 %v4583_v3  ;;  %v4518_v37 = vpack.c.bf16 %v3090_v17, %v3089_v50 }
  0xaf   : > { %3746 = vmatmul.mubr.f32.gmra.mrb[68].mxu0 %v4967_v56  ;;  %4511 = vmatprep.subr.bf16.mxu1 %v4583_v3 }
  0xb0   : > { %3859 = vmatmul.mubr.f32.gmra.mrb[68].mxu1 %v4972_v57  ;;  %3748 = vmatprep.mubr.msk.f32.mxu0 %vm4584_vm0, %v4585_v11 }
  0xb1   : > { %3861 = vmatprep.mubr.msk.f32.mxu1 %vm4584_vm0, %v4585_v11  ;;  %4489 = vmatpush3.bf16.msra.mxu0 %v4488_v42  ;;  %v3107_v42 = vld [vmem:[%s6264_s2 + $0x3a0] sm:$0xff] }
  0xb2   : > { %4513 = vmatpush3.bf16.msra.mxu1 %v4512_v43  ;;  %4514 = vmatprep.subr.bf16.mxu0 %v4583_v3  ;;  %v3108_v43 = vld [vmem:[%s6264_s2 + $0x3a8] sm:$0xff] }
  0xb3   : > { %3749 = vmatmul.mubr.f32.gmra.mrb[70].mxu0 %v4979_v58  ;;  %4538 = vmatprep.subr.bf16.mxu1 %v4583_v3 }
  0xb4   : > { %3862 = vmatmul.mubr.f32.gmra.mrb[70].mxu1 %v4984_v59  ;;  %3751 = vmatprep.mubr.msk.f32.mxu0 %vm4584_vm0, %v4585_v11 }
  0xb5   : > { %3864 = vmatprep.mubr.msk.f32.mxu1 %vm4584_vm0, %v4585_v11 }
  0xb7   : > { %3752 = vmatmul.mubr.f32.gmra.mrb[72].mxu0 %v4991_v60 }
  0xb8   : > { %3865 = vmatmul.mubr.f32.gmra.mrb[72].mxu1 %v4996_v61  ;;  %3754 = vmatprep.mubr.msk.f32.mxu0 %vm4584_vm0, %v4585_v11 }
  0xb9   : > { %3867 = vmatprep.mubr.msk.f32.mxu1 %vm4584_vm0, %v4585_v11 }
  0xbb   : > { %3755 = vmatmul.mubr.f32.gmra.mrb[74].mxu0 %v5003_v62 }
  0xbc   : > { %3868 = vmatmul.mubr.f32.gmra.mrb[74].mxu1 %v5008_v63  ;;  %3757 = vmatprep.mubr.msk.f32.mxu0 %vm4584_vm0, %v4585_v11 }
  0xbd   : > { %3870 = vmatprep.mubr.msk.f32.mxu1 %vm4584_vm0, %v4585_v11 }
  0xbf   : > { %3758 = vmatmul.mubr.f32.gmra.mrb[76].mxu0 %v5015_v0 }
  0xc0   : > { %3871 = vmatmul.mubr.f32.gmra.mrb[76].mxu1 %v5020_v1  ;;  %3760 = vmatprep.mubr.msk.f32.mxu0 %vm4584_vm0, %v4585_v11 }
  0xc1   : > { %3873 = vmatprep.mubr.msk.f32.mxu1 %vm4584_vm0, %v4585_v11 }
  0xc3   : > { %3761 = vmatmul.mubr.f32.gmra.mrb[78].mxu0 %v5027_v2 }
  0xc4   : > { %3874 = vmatmul.mubr.f32.gmra.mrb[78].mxu1 %v5032_v4  ;;  %3763 = vmatprep.mubr.msk.f32.mxu0 %vm4584_vm0, %v4585_v11 }
  0xc5   : > { %3876 = vmatprep.mubr.msk.f32.mxu1 %vm4584_vm0, %v4585_v11 }
  0xc7   : > { %3764 = vmatmul.mubr.f32.gmra.mrb[80].mxu0 %v5039_v5 }
  0xc8   : > { %3877 = vmatmul.mubr.f32.gmra.mrb[80].mxu1 %v5044_v6  ;;  %3766 = vmatprep.mubr.msk.f32.mxu0 %vm4584_vm0, %v4585_v11 }
  0xc9   : > { %3879 = vmatprep.mubr.msk.f32.mxu1 %vm4584_vm0, %v4585_v11 }
  0xcb   : > { %3767 = vmatmul.mubr.f32.gmra.mrb[82].mxu0 %v5051_v7 }
  0xcc   : > { %3880 = vmatmul.mubr.f32.gmra.mrb[82].mxu1 %v5056_v8  ;;  %3769 = vmatprep.mubr.msk.f32.mxu0 %vm4584_vm0, %v4585_v11 }
  0xcd   : > { %3882 = vmatprep.mubr.msk.f32.mxu1 %vm4584_vm0, %v4585_v11 }
  0xcf   : > { %3770 = vmatmul.mubr.f32.gmra.mrb[84].mxu0 %v5063_v9 }
  0xd0   : > { %3883 = vmatmul.mubr.f32.gmra.mrb[84].mxu1 %v5068_v10  ;;  %3772 = vmatprep.mubr.msk.f32.mxu0 %vm4584_vm0, %v4585_v11 }
  0xd1   : > { %3885 = vmatprep.mubr.msk.f32.mxu1 %vm4584_vm0, %v4585_v11 }
  0xd3   : > { %3773 = vmatmul.mubr.f32.gmra.mrb[86].mxu0 %v5075_v12 }
  0xd4   : > { %3886 = vmatmul.mubr.f32.gmra.mrb[86].mxu1 %v5080_v13  ;;  %3775 = vmatprep.mubr.msk.f32.mxu0 %vm4584_vm0, %v4585_v11 }
  0xd5   : > { %3888 = vmatprep.mubr.msk.f32.mxu1 %vm4584_vm0, %v4585_v11 }
  0xd7   : > { %3776 = vmatmul.mubr.f32.gmra.mrb[88].mxu0 %v5087_v14 }
  0xd8   : > { %3889 = vmatmul.mubr.f32.gmra.mrb[88].mxu1 %v5092_v15  ;;  %3778 = vmatprep.mubr.msk.f32.mxu0 %vm4584_vm0, %v4585_v11  ;;  %v5427_v15 = vld [vmem:[%s4744_s10 + $0xd8] sm:$0xff] }
  0xd9   : > { %3891 = vmatprep.mubr.msk.f32.mxu1 %vm4584_vm0, %v4585_v11 }
  0xdb   : > { %3779 = vmatmul.mubr.f32.gmra.mrb[90].mxu0 %v5099_v18  ;;  %v5432_v18 = vld [vmem:[%s4756_s19 + $0xd8] sm:$0xff] }
  0xdc   : > { %3892 = vmatmul.mubr.f32.gmra.mrb[90].mxu1 %v5104_v19  ;;  %3781 = vmatprep.mubr.msk.f32.mxu0 %vm4584_vm0, %v4585_v11  ;;  %v5439_v19 = vld [vmem:[%s4744_s10 + $0xe0] sm:$0xff] }
  0xdd   : > { %3894 = vmatprep.mubr.msk.f32.mxu1 %vm4584_vm0, %v4585_v11 }
  0xdf   : > { %3782 = vmatmul.mubr.f32.gmra.mrb[92].mxu0 %v5111_v20  ;;  %v5444_v20 = vld [vmem:[%s4756_s19 + $0xe0] sm:$0xff] }
  0xe0   : > { %3895 = vmatmul.mubr.f32.gmra.mrb[92].mxu1 %v5116_v21  ;;  %3784 = vmatprep.mubr.msk.f32.mxu0 %vm4584_vm0, %v4585_v11  ;;  %v5451_v21 = vld [vmem:[%s4744_s10 + $0xe8] sm:$0xff] }
  0xe1   : > { %3897 = vmatprep.mubr.msk.f32.mxu1 %vm4584_vm0, %v4585_v11 }
  0xe3   : > { %3785 = vmatmul.mubr.f32.gmra.mrb[94].mxu0 %v5123_v22  ;;  %v5456_v22 = vld [vmem:[%s4756_s19 + $0xe8] sm:$0xff] }
  0xe4   : > { %3898 = vmatmul.mubr.f32.gmra.mrb[94].mxu1 %v5128_v23  ;;  %3787 = vmatprep.mubr.msk.f32.mxu0 %vm4584_vm0, %v4585_v11  ;;  %v3087_v23 = vld [vmem:[%s6264_s2 + $0x300] sm:$0xff] }
  0xe5   : > { %3900 = vmatprep.mubr.msk.f32.mxu1 %vm4584_vm0, %v4585_v11 }
  0xe7   : > { %3788 = vmatmul.mubr.f32.gmra.mrb[96].mxu0 %v5135_v26  ;;  %v3088_v26 = vld [vmem:[%s6264_s2 + $0x308] sm:$0xff] }
  0xe8   : > { %3901 = vmatmul.mubr.f32.gmra.mrb[96].mxu1 %v5140_v27  ;;  %3790 = vmatprep.mubr.msk.f32.mxu0 %vm4584_vm0, %v4585_v11  ;;  %v4515_v46 = vpack.c.bf16 %v3088_v26, %v3087_v23 }
  0xe9   : > { %3903 = vmatprep.mubr.msk.f32.mxu1 %vm4584_vm0, %v4585_v11 }
  0xeb   : > { %3791 = vmatmul.mubr.f32.gmra.mrb[98].mxu0 %v5147_v28  ;;  %v3103_v28 = vld [vmem:[%s6264_s2 + $0x380] sm:$0xff] }
  0xec   : > { %3904 = vmatmul.mubr.f32.gmra.mrb[98].mxu1 %v5152_v29  ;;  %3793 = vmatprep.mubr.msk.f32.mxu0 %vm4584_vm0, %v4585_v11  ;;  %v3104_v29 = vld [vmem:[%s6264_s2 + $0x388] sm:$0xff] }
  0xed   : > { %3906 = vmatprep.mubr.msk.f32.mxu1 %vm4584_vm0, %v4585_v11  ;;  %v4539_v16 = vpack.c.bf16 %v3104_v29, %v3103_v28  ;;  %v4545_v28 = vpack.c.bf16 %v3108_v43, %v3107_v42  ;;  %v3093_v29 = vld [vmem:[%s6264_s2 + $0x330] sm:$0xff]  ;;  %v3114_v43 = vld [vmem:[%s6264_s2 + $0x3d8] sm:$0xff] }
  0xee   : > { %v3113_v42 = vld [vmem:[%s6264_s2 + $0x3d0] sm:$0xff] }
  0xef   : > { %3794 = vmatmul.mubr.f32.gmra.mrb[100].mxu0 %v5159_v30 }
  0xf0   : > { %3907 = vmatmul.mubr.f32.gmra.mrb[100].mxu1 %v5164_v31  ;;  %3796 = vmatprep.mubr.msk.f32.mxu0 %vm4584_vm0, %v4585_v11 }
  0xf1   : > { %3909 = vmatprep.mubr.msk.f32.mxu1 %vm4584_vm0, %v4585_v11 }
  0xf3   : > { %3797 = vmatmul.mubr.f32.gmra.mrb[102].mxu0 %v5427_v15 }
  0xf4   : > { %3910 = vmatmul.mubr.f32.gmra.mrb[102].mxu1 %v5432_v18  ;;  %3799 = vmatprep.mubr.msk.f32.mxu0 %vm4584_vm0, %v4585_v11 }
  0xf5   : > { %3912 = vmatprep.mubr.msk.f32.mxu1 %vm4584_vm0, %v4585_v11 }
  0xf7   : > { %3800 = vmatmul.mubr.f32.gmra.mrb[104].mxu0 %v5439_v19 }
  0xf8   : > { %3913 = vmatmul.mubr.f32.gmra.mrb[104].mxu1 %v5444_v20  ;;  %3802 = vmatprep.mubr.msk.f32.mxu0 %vm4584_vm0, %v4585_v11 }
  0xf9   : > { %3915 = vmatprep.mubr.msk.f32.mxu1 %vm4584_vm0, %v4585_v11 }
  0xfa   : > { %v327_v27 = vpop.f32.mrb[0].mxu0 }
  0xfb   : > { %v3500_v30 = vpop.f32.mrb[1].mxu0  ;;  %v625_v31 = vpop.f32.mrb[0].mxu1  ;;  %3803 = vmatmul.mubr.f32.gmra.mrb[106].mxu0 %v5451_v21 }
  0xfc   : > { %v5471_v44 = vadd.f32 %v625_v31, %v327_v27  ;;  %v3613_v45 = vpop.f32.mrb[1].mxu1  ;;  %3916 = vmatmul.mubr.f32.gmra.mrb[106].mxu1 %v5456_v22  ;;  %3950 = vmatprep.mubr.msk.f32.mxu0 %vm4584_vm0, %v4585_v11 }
  0xfd   : > { %4063 = vmatprep.mubr.msk.f32.mxu1 %vm4584_vm0, %v4585_v11  ;;  %v3109_v45 = vld [vmem:[%s6264_s2 + $0x3b0] sm:$0xff] }
  0xfe   : > { %v332_v47 = vpop.f32.mrb[2].mxu0 }
  0xff   : > { %v3503_v51 = vpop.f32.mrb[3].mxu0  ;;  %v630_v24 = vpop.f32.mrb[2].mxu1  ;;  %3951 = vmatmul.mubr.f32.vlgmr.msra.gmra.mrb[108].mxu0 %v4901_v40 }
 0x100   : > { %v5491_v25 = vadd.f32 %v630_v24, %v332_v47  ;;  %4516 = vmatpush3.bf16.msra.mxu0 %v4515_v46  ;;  %v3616_v36 = vpop.f32.mrb[3].mxu1  ;;  %4064 = vmatmul.mubr.f32.vlgmr.msra.gmra.mrb[108].mxu1 %v4906_v41  ;;  %v3092_v41 = vld [vmem:[%s6264_s2 + $0x328] sm:$0xff]  ;;  %v3110_v46 = vld [vmem:[%s6264_s2 + $0x3b8] sm:$0xff]  ;;  %v3095_v51 = vld [vmem:[%s6264_s2 + $0x340] sm:$0xff] }
 0x101   : > { %3953 = vmatprep.mubr.msk.f32.mxu0 %vm4584_vm0, %v4585_v11  ;;  %4540 = vmatpush3.bf16.msra.mxu1 %v4539_v16  ;;  %v4548_v17 = vpack.c.bf16 %v3110_v46, %v3109_v45  ;;  %v3112_v36 = vld [vmem:[%s6264_s2 + $0x3c8] sm:$0xff] }
 0x102   : > { %v337_v40 = vpop.f32.mrb[4].mxu0  ;;  %4066 = vmatprep.mubr.msk.f32.mxu1 %vm4584_vm0, %v4585_v11  ;;  %4517 = vmatprep.subr.bf16.mxu0 %v4583_v3  ;;  %v3116_v45 = vld [vmem:[%s6264_s2 + $0x3e8] sm:$0xff] }
 0x103   : > { %v3506_v39 = vpop.f32.mrb[5].mxu0  ;;  %v635_v33 = vpop.f32.mrb[4].mxu1  ;;  %3954 = vmatmul.mubr.f32.gmra.mrb[110].mxu0 %v4927_v48  ;;  %4541 = vmatprep.subr.bf16.mxu1 %v4583_v3  ;;  %v4521_v48 = vpack.c.bf16 %v3092_v41, %v3091_v38  ;;  %v4551_v38 = vpack.c.bf16 %v3112_v36, %v3111_v35  ;;  %v3097_v41 = vld [vmem:[%s6264_s2 + $0x350] sm:$0xff] }
 0x104   : > { %v5513_v23 = vadd.f32 %v635_v33, %v337_v40  ;;  %v3619_v26 = vpop.f32.mrb[5].mxu1  ;;  %4067 = vmatmul.mubr.f32.gmra.mrb[110].mxu1 %v4932_v49  ;;  %3956 = vmatprep.mubr.msk.f32.mxu0 %vm4584_vm0, %v4585_v11  ;;  %v3094_v49 = vld [vmem:[%s6264_s2 + $0x338] sm:$0xff] }
 0x105   : > { %4069 = vmatprep.mubr.msk.f32.mxu1 %vm4584_vm0, %v4585_v11  ;;  %4519 = vmatpush3.bf16.msra.mxu0 %v4518_v37 }
 0x106   : > { %v342_v27 = vpop.f32.mrb[6].mxu0  ;;  %4543 = vmatpush3.bf16.msra.mxu1 %v4542_v32  ;;  %4520 = vmatprep.subr.bf16.mxu0 %v4583_v3 }
 0x107   : > { %v3509_v30 = vpop.f32.mrb[7].mxu0  ;;  %v640_v31 = vpop.f32.mrb[6].mxu1  ;;  %3957 = vmatmul.mubr.f32.gmra.mrb[112].mxu0 %v4941_v52  ;;  %4544 = vmatprep.subr.bf16.mxu1 %v4583_v3  ;;  %v4524_v52 = vpack.c.bf16 %v3094_v49, %v3093_v29  ;;  %v3099_v29 = vld [vmem:[%s6264_s2 + $0x360] sm:$0xff] }
 0x108   : > { %v5535_v16 = vadd.f32 %v640_v31, %v342_v27  ;;  %v3622_v47 = vpop.f32.mrb[7].mxu1  ;;  %4070 = vmatmul.mubr.f32.gmra.mrb[112].mxu1 %v4946_v53  ;;  %3959 = vmatprep.mubr.msk.f32.mxu0 %vm4584_vm0, %v4585_v11  ;;  %v3096_v53 = vld [vmem:[%s6264_s2 + $0x348] sm:$0xff]  ;;  %v3115_v31 = vld [vmem:[%s6264_s2 + $0x3e0] sm:$0xff] }
 0x109   : > { %4072 = vmatprep.mubr.msk.f32.mxu1 %vm4584_vm0, %v4585_v11  ;;  %4522 = vmatpush3.bf16.msra.mxu0 %v4521_v48 }
 0x10a   : > { %v347_v50 = vpop.f32.mrb[8].mxu0  ;;  %4546 = vmatpush3.bf16.msra.mxu1 %v4545_v28  ;;  %4523 = vmatprep.subr.bf16.mxu0 %v4583_v3  ;;  %v4554_v28 = vpack.c.bf16 %v3114_v43, %v3113_v42 }
 0x10b   : > { %v3512_v24 = vpop.f32.mrb[9].mxu0  ;;  %v645_v34 = vpop.f32.mrb[8].mxu1  ;;  %3960 = vmatmul.mubr.f32.gmra.mrb[114].mxu0 %v4955_v54  ;;  %4547 = vmatprep.subr.bf16.mxu1 %v4583_v3  ;;  %v4527_v54 = vpack.c.bf16 %v3096_v53, %v3095_v51 }
 0x10c   : > { %v5557_v37 = vadd.f32 %v645_v34, %v347_v50  ;;  %v3625_v40 = vpop.f32.mrb[9].mxu1  ;;  %4073 = vmatmul.mubr.f32.gmra.mrb[114].mxu1 %v4960_v55  ;;  %3962 = vmatprep.mubr.msk.f32.mxu0 %vm4584_vm0, %v4585_v11  ;;  %v3098_v55 = vld [vmem:[%s6264_s2 + $0x358] sm:$0xff]  ;;  %v4557_v50 = vpack.c.bf16 %v3116_v45, %v3115_v31  ;;  %v3117_v24 = vld [vmem:[%s6264_s2 + $0x3f0] sm:$0xff] }
 0x10d   : > { %4075 = vmatprep.mubr.msk.f32.mxu1 %vm4584_vm0, %v4585_v11  ;;  %4525 = vmatpush3.bf16.msra.mxu0 %v4524_v52  ;;  %v3118_v34 = vld [vmem:[%s6264_s2 + $0x3f8] sm:$0xff] }
 0x10e   : > { %v352_v32 = vpop.f32.mrb[10].mxu0  ;;  %4549 = vmatpush3.bf16.msra.mxu1 %v4548_v17  ;;  %4526 = vmatprep.subr.bf16.mxu0 %v4583_v3  ;;  %v3101_v17 = vld [vmem:[%s6264_s2 + $0x370] sm:$0xff] }
 0x10f   : > { %v3515_v39 = vpop.f32.mrb[11].mxu0  ;;  %v650_v33 = vpop.f32.mrb[10].mxu1  ;;  %3963 = vmatmul.mubr.f32.gmra.mrb[116].mxu0 %v4967_v56  ;;  %4550 = vmatprep.subr.bf16.mxu1 %v4583_v3  ;;  %v4530_v56 = vpack.c.bf16 %v3098_v55, %v3097_v41 }
 0x110   : > { %v5579_v26 = vadd.f32 %v650_v33, %v352_v32  ;;  %v3628_v48 = vpop.f32.mrb[11].mxu1  ;;  %4076 = vmatmul.mubr.f32.gmra.mrb[116].mxu1 %v4972_v57  ;;  %3965 = vmatprep.mubr.msk.f32.mxu0 %vm4584_vm0, %v4585_v11  ;;  %v3100_v57 = vld [vmem:[%s6264_s2 + $0x368] sm:$0xff] }
 0x111   : > { %4078 = vmatprep.mubr.msk.f32.mxu1 %vm4584_vm0, %v4585_v11  ;;  %4528 = vmatpush3.bf16.msra.mxu0 %v4527_v54  ;;  %v4560_v54 = vpack.c.bf16 %v3118_v34, %v3117_v24 }
 0x112   : > { %v357_v27 = vpop.f32.mrb[12].mxu0  ;;  %4552 = vmatpush3.bf16.msra.mxu1 %v4551_v38  ;;  %4529 = vmatprep.subr.bf16.mxu0 %v4583_v3 }
 0x113   : > { %v3518_v49 = vpop.f32.mrb[13].mxu0  ;;  %v655_v30 = vpop.f32.mrb[12].mxu1  ;;  %3966 = vmatmul.mubr.f32.gmra.mrb[118].mxu0 %v4979_v58  ;;  %4553 = vmatprep.subr.bf16.mxu1 %v4583_v3  ;;  %v4533_v58 = vpack.c.bf16 %v3100_v57, %v3099_v29 }
 0x114   : > { %v5601_v46 = vadd.f32 %v655_v30, %v357_v27  ;;  %v3631_v47 = vpop.f32.mrb[13].mxu1  ;;  %4079 = vmatmul.mubr.f32.gmra.mrb[118].mxu1 %v4984_v59  ;;  %3968 = vmatprep.mubr.msk.f32.mxu0 %vm4584_vm0, %v4585_v11  ;;  %v3102_v59 = vld [vmem:[%s6264_s2 + $0x378] sm:$0xff] }
 0x115   : > { %4081 = vmatprep.mubr.msk.f32.mxu1 %vm4584_vm0, %v4585_v11  ;;  %4531 = vmatpush3.bf16.msra.mxu0 %v4530_v56 }
 0x116   : > { %v362_v52 = vpop.f32.mrb[14].mxu0  ;;  %4555 = vmatpush3.bf16.msra.mxu1 %v4554_v28  ;;  %4532 = vmatprep.subr.bf16.mxu0 %v4583_v3 }
 0x117   : > { %v3521_v51 = vpop.f32.mrb[15].mxu0  ;;  %v660_v53 = vpop.f32.mrb[14].mxu1  ;;  %3969 = vmatmul.mubr.f32.gmra.mrb[120].mxu0 %v4991_v60  ;;  %4556 = vmatprep.subr.bf16.mxu1 %v4583_v3  ;;  %v4536_v60 = vpack.c.bf16 %v3102_v59, %v3101_v17 }
 0x118   : > { %v5623_v35 = vadd.f32 %v660_v53, %v362_v52  ;;  %v3634_v36 = vpop.f32.mrb[15].mxu1  ;;  %4082 = vmatmul.mubr.f32.gmra.mrb[120].mxu1 %v4996_v61  ;;  %3971 = vmatprep.mubr.msk.f32.mxu0 %vm4584_vm0, %v4585_v11  ;;  %v5703_v53 = vld [vmem:[%s4756_s19 + $0xa8] sm:$0xff] }
 0x119   : > { %4084 = vmatprep.mubr.msk.f32.mxu1 %vm4584_vm0, %v4585_v11  ;;  %4534 = vmatpush3.bf16.msra.mxu0 %v4533_v58 }
 0x11a   : > { %v367_v40 = vpop.f32.mrb[16].mxu0  ;;  %4558 = vmatpush3.bf16.msra.mxu1 %v4557_v50  ;;  %4535 = vmatprep.subr.bf16.mxu0 %v4583_v3 }
 0x11b   : > { %v3524_v32 = vpop.f32.mrb[17].mxu0  ;;  %v665_v38 = vpop.f32.mrb[16].mxu1  ;;  %3972 = vmatmul.mubr.f32.gmra.mrb[122].mxu0 %v5003_v62  ;;  %4559 = vmatprep.subr.bf16.mxu1 %v4583_v3 }
 0x11c   : > { %v5633_v61 = vadd.f32 %v665_v38, %v367_v40  ;;  %v3637_v41 = vpop.f32.mrb[17].mxu1  ;;  %4085 = vmatmul.mubr.f32.gmra.mrb[122].mxu1 %v5008_v63  ;;  %3974 = vmatprep.mubr.msk.f32.mxu0 %vm4584_vm0, %v4585_v11  ;;  %v5712_v40 = vld [vmem:[%s4744_s10 + $0xb0] sm:$0xff] }
 0x11d   : > { %4087 = vmatprep.mubr.msk.f32.mxu1 %vm4584_vm0, %v4585_v11  ;;  %4537 = vmatpush3.bf16.msra.mxu0 %v4536_v60 }
 0x11e   : > { %v372_v55 = vpop.f32.mrb[18].mxu0  ;;  %4561 = vmatpush3.bf16.msra.mxu1 %v4560_v54  ;;  %v5717_v54 = vld [vmem:[%s4756_s19 + $0xb0] sm:$0xff] }
 0x11f   : > { %v3527_v39 = vpop.f32.mrb[19].mxu0  ;;  %v670_v33 = vpop.f32.mrb[18].mxu1  ;;  %3975 = vmatmul.mubr.f32.gmra.mrb[124].mxu0 %v5015_v0 }
 0x120   : > { %v5641_v62 = vadd.f32 %v670_v33, %v372_v55  ;;  %v3640_v3 = vpop.f32.mrb[19].mxu1  ;;  %4088 = vmatmul.mubr.f32.gmra.mrb[124].mxu1 %v5020_v1  ;;  %3977 = vmatprep.mubr.msk.f32.mxu0 %vm4584_vm0, %v4585_v11  ;;  %v5726_v33 = vld [vmem:[%s4744_s10 + $0xb8] sm:$0xff] }
 0x121   : > { %4090 = vmatprep.mubr.msk.f32.mxu1 %vm4584_vm0, %v4585_v11  ;;  %v5731_v3 = vld [vmem:[%s4756_s19 + $0xb8] sm:$0xff] }
 0x122   : > { %v377_v63 = vpop.f32.mrb[20].mxu0 }
 0x123   : > { %v3530_v42 = vpop.f32.mrb[21].mxu0  ;;  %v675_v43 = vpop.f32.mrb[20].mxu1  ;;  %3978 = vmatmul.mubr.f32.gmra.mrb[126].mxu0 %v5027_v2 }
 0x124   : > { %v5649_v48 = vadd.f32 %v675_v43, %v377_v63  ;;  %v3643_v56 = vpop.f32.mrb[21].mxu1  ;;  %4091 = vmatmul.mubr.f32.gmra.mrb[126].mxu1 %v5032_v4  ;;  %3980 = vmatprep.mubr.msk.f32.mxu0 %vm4584_vm0, %v4585_v11 }
 0x125   : > { %4093 = vmatprep.mubr.msk.f32.mxu1 %vm4584_vm0, %v4585_v11 }
 0x126   : > { %v382_v0 = vpop.f32.mrb[22].mxu0 }
 0x127   : > { %v3533_v1 = vpop.f32.mrb[23].mxu0  ;;  %v680_v27 = vpop.f32.mrb[22].mxu1  ;;  %3981 = vmatmul.mubr.f32.gmra.mrb[128].mxu0 %v5039_v5 }
 0x128   : > { %v5657_v28 = vadd.f32 %v680_v27, %v382_v0  ;;  %v3646_v29 = vpop.f32.mrb[23].mxu1  ;;  %4094 = vmatmul.mubr.f32.gmra.mrb[128].mxu1 %v5044_v6  ;;  %3983 = vmatprep.mubr.msk.f32.mxu0 %vm4584_vm0, %v4585_v11  ;;  %v5740_v1 = vld [vmem:[%s4744_s10 + $0xc0] sm:$0xff] }
 0x129   : > { %4096 = vmatprep.mubr.msk.f32.mxu1 %vm4584_vm0, %v4585_v11  ;;  %v5745_v27 = vld [vmem:[%s4756_s19 + $0xc0] sm:$0xff] }
 0x12a   : > { %v387_v2 = vpop.f32.mrb[24].mxu0 }
 0x12b   : > { %v3536_v4 = vpop.f32.mrb[25].mxu0  ;;  %v685_v57 = vpop.f32.mrb[24].mxu1  ;;  %3984 = vmatmul.mubr.f32.gmra.mrb[130].mxu0 %v5051_v7 }
 0x12c   : > { %v5665_v49 = vadd.f32 %v685_v57, %v387_v2  ;;  %v3649_v30 = vpop.f32.mrb[25].mxu1  ;;  %4097 = vmatmul.mubr.f32.gmra.mrb[130].mxu1 %v5056_v8  ;;  %3986 = vmatprep.mubr.msk.f32.mxu0 %vm4584_vm0, %v4585_v11 }
 0x12d   : > { %4099 = vmatprep.mubr.msk.f32.mxu1 %vm4584_vm0, %v4585_v11 }
 0x12e   : > { %v392_v5 = vpop.f32.mrb[26].mxu0 }
 0x12f   : > { %v3539_v6 = vpop.f32.mrb[27].mxu0  ;;  %v690_v31 = vpop.f32.mrb[26].mxu1  ;;  %3987 = vmatmul.mubr.f32.gmra.mrb[132].mxu0 %v5063_v9 }
 0x130   : > { %v5673_v45 = vadd.f32 %v690_v31, %v392_v5  ;;  %v3652_v7 = vpop.f32.mrb[27].mxu1  ;;  %4100 = vmatmul.mubr.f32.gmra.mrb[132].mxu1 %v5068_v10  ;;  %3989 = vmatprep.mubr.msk.f32.mxu0 %vm4584_vm0, %v4585_v11  ;;  %v5689_v10 = vld [vmem:[%s4756_s19 + $0xa0] sm:$0xff]  ;;  %v5754_v5 = vld [vmem:[%s4744_s10 + $0xc8] sm:$0xff] }
 0x131   : > { %4102 = vmatprep.mubr.msk.f32.mxu1 %vm4584_vm0, %v4585_v11  ;;  %v5759_v6 = vld [vmem:[%s4756_s19 + $0xc8] sm:$0xff] }
 0x132   : > { %v397_v8 = vpop.f32.mrb[28].mxu0 }
 0x133   : > { %v3542_v47 = vpop.f32.mrb[29].mxu0  ;;  %v695_v58 = vpop.f32.mrb[28].mxu1  ;;  %3990 = vmatmul.mubr.f32.gmra.mrb[134].mxu0 %v5075_v12 }
 0x134   : > { %v5681_v52 = vadd.f32 %v695_v58, %v397_v8  ;;  %v3655_v9 = vpop.f32.mrb[29].mxu1  ;;  %4103 = vmatmul.mubr.f32.gmra.mrb[134].mxu1 %v5080_v13  ;;  %3992 = vmatprep.mubr.msk.f32.mxu0 %vm4584_vm0, %v4585_v11  ;;  %v5698_v13 = vld [vmem:[%s4744_s10 + $0xa8] sm:$0xff] }
 0x135   : > { %4105 = vmatprep.mubr.msk.f32.mxu1 %vm4584_vm0, %v4585_v11  ;;  %v5768_v9 = vld [vmem:[%s4744_s10 + $0xd0] sm:$0xff] }
 0x136   : > { %v402_v50 = vpop.f32.mrb[30].mxu0 }
 0x137   : > { %v3545_v17 = vpop.f32.mrb[31].mxu0  ;;  %v700_v59 = vpop.f32.mrb[30].mxu1  ;;  %3993 = vmatmul.mubr.f32.gmra.mrb[136].mxu0 %v5087_v14 }
 0x138   : > { %v5692_v12 = vadd.f32 %v700_v59, %v402_v50  ;;  %v3658_v51 = vpop.f32.mrb[31].mxu1  ;;  %4106 = vmatmul.mubr.f32.gmra.mrb[136].mxu1 %v5689_v10  ;;  %3995 = vmatprep.mubr.msk.f32.mxu0 %vm4584_vm0, %v4585_v11  ;;  %v5773_v50 = vld [vmem:[%s4756_s19 + $0xd0] sm:$0xff] }
 0x139   : > { %4108 = vmatprep.mubr.msk.f32.mxu1 %vm4584_vm0, %v4585_v11 }
 0x13a   : > { %v407_v24 = vpop.f32.mrb[32].mxu0 }
 0x13b   : > { %v3548_v34 = vpop.f32.mrb[33].mxu0  ;;  %v705_v14 = vpop.f32.mrb[32].mxu1  ;;  %3996 = vmatmul.mubr.f32.gmra.mrb[138].mxu0 %v5698_v13 }
 0x13c   : > { %v5706_v36 = vadd.f32 %v705_v14, %v407_v24  ;;  %v3661_v60 = vpop.f32.mrb[33].mxu1  ;;  %4109 = vmatmul.mubr.f32.gmra.mrb[138].mxu1 %v5703_v53  ;;  %3998 = vmatprep.mubr.msk.f32.mxu0 %vm4584_vm0, %v4585_v11 }
 0x13d   : > { %4111 = vmatprep.mubr.msk.f32.mxu1 %vm4584_vm0, %v4585_v11 }
 0x13e   : > { %v412_v32 = vpop.f32.mrb[34].mxu0 }
 0x13f   : > { %v3551_v38 = vpop.f32.mrb[35].mxu0  ;;  %v710_v41 = vpop.f32.mrb[34].mxu1  ;;  %3999 = vmatmul.mubr.f32.gmra.mrb[140].mxu0 %v5712_v40 }
 0x140   : > { %v5720_v55 = vadd.f32 %v710_v41, %v412_v32  ;;  %v3664_v39 = vpop.f32.mrb[35].mxu1  ;;  %4112 = vmatmul.mubr.f32.gmra.mrb[140].mxu1 %v5717_v54  ;;  %4001 = vmatprep.mubr.msk.f32.mxu0 %vm4584_vm0, %v4585_v11 }
 0x141   : > { %4114 = vmatprep.mubr.msk.f32.mxu1 %vm4584_vm0, %v4585_v11 }
 0x142   : > { %v417_v63 = vpop.f32.mrb[36].mxu0 }
 0x143   : > { %v3554_v42 = vpop.f32.mrb[37].mxu0  ;;  %v715_v43 = vpop.f32.mrb[36].mxu1  ;;  %4002 = vmatmul.mubr.f32.gmra.mrb[142].mxu0 %v5726_v33 }
 0x144   : > { %v5734_v56 = vadd.f32 %v715_v43, %v417_v63  ;;  %v3667_v0 = vpop.f32.mrb[37].mxu1  ;;  %4115 = vmatmul.mubr.f32.gmra.mrb[142].mxu1 %v5731_v3  ;;  %4004 = vmatprep.mubr.msk.f32.mxu0 %vm4584_vm0, %v4585_v11 }
 0x145   : > { %4117 = vmatprep.mubr.msk.f32.mxu1 %vm4584_vm0, %v4585_v11 }
 0x146   : > { %v422_v29 = vpop.f32.mrb[38].mxu0 }
 0x147   : > { %v3557_v2 = vpop.f32.mrb[39].mxu0  ;;  %v720_v4 = vpop.f32.mrb[38].mxu1  ;;  %4005 = vmatmul.mubr.f32.gmra.mrb[144].mxu0 %v5740_v1 }
 0x148   : > { %v5748_v57 = vadd.f32 %v720_v4, %v422_v29  ;;  %v3670_v30 = vpop.f32.mrb[39].mxu1  ;;  %4118 = vmatmul.mubr.f32.gmra.mrb[144].mxu1 %v5745_v27  ;;  %4007 = vmatprep.mubr.msk.f32.mxu0 %vm4584_vm0, %v4585_v11  ;;  %v5811_v4 = vld [vmem:[%s4756_s19 + $0xf0] sm:$0xff] }
 0x149   : > { %4120 = vmatprep.mubr.msk.f32.mxu1 %vm4584_vm0, %v4585_v11 }
 0x14a   : > { %v427_v31 = vpop.f32.mrb[40].mxu0 }
 0x14b   : > { %v3560_v7 = vpop.f32.mrb[41].mxu0  ;;  %v725_v8 = vpop.f32.mrb[40].mxu1  ;;  %4008 = vmatmul.mubr.f32.gmra.mrb[146].mxu0 %v5754_v5 }
 0x14c   : > { %v5762_v47 = vadd.f32 %v725_v8, %v427_v31  ;;  %v3673_v58 = vpop.f32.mrb[41].mxu1  ;;  %4121 = vmatmul.mubr.f32.gmra.mrb[146].mxu1 %v5759_v6  ;;  %4010 = vmatprep.mubr.msk.f32.mxu0 %vm4584_vm0, %v4585_v11 }
 0x14d   : > { %4123 = vmatprep.mubr.msk.f32.mxu1 %vm4584_vm0, %v4585_v11  ;;  %v5825_v58 = vld [vmem:[%s4756_s19 + $0xf8] sm:$0xff] }
 0x14e   : > { %v432_v17 = vpop.f32.mrb[42].mxu0 }
 0x14f   : > { %v3563_v59 = vpop.f32.mrb[43].mxu0  ;;  %v730_v51 = vpop.f32.mrb[42].mxu1  ;;  %4011 = vmatmul.mubr.f32.gmra.mrb[148].mxu0 %v5768_v9 }
 0x150   : > { %v5776_v24 = vadd.f32 %v730_v51, %v432_v17  ;;  %v3676_v34 = vpop.f32.mrb[43].mxu1  ;;  %4124 = vmatmul.mubr.f32.gmra.mrb[148].mxu1 %v5773_v50  ;;  %4013 = vmatprep.mubr.msk.f32.mxu0 %vm4584_vm0, %v4585_v11 }
 0x151   : > { %4126 = vmatprep.mubr.msk.f32.mxu1 %vm4584_vm0, %v4585_v11 }
 0x152   : > { %v437_v14 = vpop.f32.mrb[44].mxu0 }
 0x153   : > { %v3566_v60 = vpop.f32.mrb[45].mxu0  ;;  %v735_v32 = vpop.f32.mrb[44].mxu1  ;;  %4014 = vmatmul.mubr.f32.gmra.mrb[150].mxu0 %v5427_v15 }
 0x154   : > { %v5784_v38 = vadd.f32 %v735_v32, %v437_v14  ;;  %v3679_v41 = vpop.f32.mrb[45].mxu1  ;;  %4127 = vmatmul.mubr.f32.gmra.mrb[150].mxu1 %v5432_v18  ;;  %4016 = vmatprep.mubr.msk.f32.mxu0 %vm4584_vm0, %v4585_v11  ;;  %v5834_v60 = vld [vmem:[%s4744_s10 + $0x100] sm:$0xff] }
 0x155   : > { %4129 = vmatprep.mubr.msk.f32.mxu1 %vm4584_vm0, %v4585_v11  ;;  %v5839_v32 = vld [vmem:[%s4756_s19 + $0x100] sm:$0xff] }
 0x156   : > { %v442_v39 = vpop.f32.mrb[46].mxu0 }
 0x157   : > { %v3569_v63 = vpop.f32.mrb[47].mxu0  ;;  %v740_v42 = vpop.f32.mrb[46].mxu1  ;;  %4017 = vmatmul.mubr.f32.gmra.mrb[152].mxu0 %v5439_v19 }
 0x158   : > { %v5792_v43 = vadd.f32 %v740_v42, %v442_v39  ;;  %v3682_v15 = vpop.f32.mrb[47].mxu1  ;;  %4130 = vmatmul.mubr.f32.gmra.mrb[152].mxu1 %v5444_v20  ;;  %4019 = vmatprep.mubr.msk.f32.mxu0 %vm4584_vm0, %v4585_v11  ;;  %v5806_v20 = vld [vmem:[%s4744_s10 + $0xf0] sm:$0xff] }
 0x159   : > { %4132 = vmatprep.mubr.msk.f32.mxu1 %vm4584_vm0, %v4585_v11 }
 0x15a   : > { %v447_v18 = vpop.f32.mrb[48].mxu0 }
 0x15b   : > { %v3572_v0 = vpop.f32.mrb[49].mxu0  ;;  %v745_v29 = vpop.f32.mrb[48].mxu1  ;;  %4020 = vmatmul.mubr.f32.gmra.mrb[154].mxu0 %v5451_v21 }
 0x15c   : > { %v5800_v2 = vadd.f32 %v745_v29, %v447_v18  ;;  %v3685_v19 = vpop.f32.mrb[49].mxu1  ;;  %4133 = vmatmul.mubr.f32.gmra.mrb[154].mxu1 %v5456_v22  ;;  %4022 = vmatprep.mubr.msk.f32.mxu0 %vm4584_vm0, %v4585_v11  ;;  %v5820_v22 = vld [vmem:[%s4744_s10 + $0xf8] sm:$0xff]  ;;  %v2140_v18 = vld [vmem:[%s4744_s10 + $0x48] sm:$0xff] }
 0x15d   : > { %4135 = vmatprep.mubr.msk.f32.mxu1 %vm4584_vm0, %v4585_v11  ;;  %v2465_v29 = vld [vmem:[%s4756_s19 + $0x48] sm:$0xff] }
 0x15e   : > { %v452_v30 = vpop.f32.mrb[50].mxu0 }
 0x15f   : > { %v3575_v31 = vpop.f32.mrb[51].mxu0  ;;  %v750_v21 = vpop.f32.mrb[50].mxu1  ;;  %4023 = vmatmul.mubr.f32.gmra.mrb[156].mxu0 %v5806_v20 }
 0x160   : > { %v5814_v7 = vadd.f32 %v750_v21, %v452_v30  ;;  %v3688_v8 = vpop.f32.mrb[51].mxu1  ;;  %4136 = vmatmul.mubr.f32.gmra.mrb[156].mxu1 %v5811_v4  ;;  %4025 = vmatprep.mubr.msk.f32.mxu0 %vm4584_vm0, %v4585_v11 }
 0x161   : > { %4138 = vmatprep.mubr.msk.f32.mxu1 %vm4584_vm0, %v4585_v11  ;;  %v2141_v8 = vld [vmem:[%s4744_s10 + $0x50] sm:$0xff] }
 0x162   : > { %v457_v17 = vpop.f32.mrb[52].mxu0 }
 0x163   : > { %v3578_v59 = vpop.f32.mrb[53].mxu0  ;;  %v755_v51 = vpop.f32.mrb[52].mxu1  ;;  %4026 = vmatmul.mubr.f32.gmra.mrb[158].mxu0 %v5820_v22 }
 0x164   : > { %v5828_v34 = vadd.f32 %v755_v51, %v457_v17  ;;  %v3691_v14 = vpop.f32.mrb[53].mxu1  ;;  %4139 = vmatmul.mubr.f32.gmra.mrb[158].mxu1 %v5825_v58  ;;  %4028 = vmatprep.mubr.msk.f32.mxu0 %vm4584_vm0, %v4585_v11  ;;  %v2466_v59 = vld [vmem:[%s4756_s19 + $0x50] sm:$0xff] }
 0x165   : > { %4141 = vmatprep.mubr.msk.f32.mxu1 %vm4584_vm0, %v4585_v11 }
 0x166   : > { %v950_v41 = vpop.f32.mrb[54].mxu0 }
 0x167   : > { %v1084_v39 = vadd.f32 %v950_v41, %v5471_v44  ;;  %v3726_v63 = vpop.f32.mrb[55].mxu0  ;;  %4029 = vmatmul.mubr.f32.gmra.mrb[160].mxu0 %v5834_v60  ;;  %v1275_v42 = vpop.f32.mrb[54].mxu1 }
 0x168   : > { %v3839_v15 = vpop.f32.mrb[55].mxu1  ;;  %4142 = vmatmul.mubr.f32.gmra.mrb[160].mxu1 %v5839_v32  ;;  %4176 = vmatprep.mubr.msk.f32.mxu0 %vm4584_vm0, %v4585_v11  ;;  %v2142_v63 = vld [vmem:[%s4744_s10 + $0x58] sm:$0xff] }
 0x169   : > { %v5847_v0 = vadd.f32 %v1275_v42, %v1084_v39  ;;  %4289 = vmatprep.mubr.msk.f32.mxu1 %vm4584_vm0, %v4585_v11  ;;  %v2467_v15 = vld [vmem:[%s4756_s19 + $0x58] sm:$0xff] }
 0x16a   : > { %v955_v44 = vpop.f32.mrb[56].mxu0 }
 0x16b   : > { %v1085_v19 = vadd.f32 %v955_v44, %v5491_v25  ;;  %v3729_v30 = vpop.f32.mrb[57].mxu0  ;;  %4177 = vmatmul.mubr.f32.vlgmr.msra.gmra.mrb[162].mxu0 %v2140_v18  ;;  %v1280_v31 = vpop.f32.mrb[56].mxu1 }
 0x16c   : > { %v3842_v21 = vpop.f32.mrb[57].mxu1  ;;  %4290 = vmatmul.mubr.f32.vlgmr.msra.gmra.mrb[162].mxu1 %v2465_v29  ;;  %4179 = vmatprep.mubr.msk.f32.mxu0 %vm4584_vm0, %v4585_v11  ;;  %v2143_v30 = vld [vmem:[%s4744_s10 + $0x60] sm:$0xff] }
 0x16d   : > { %v5856_v17 = vadd.f32 %v1280_v31, %v1085_v19  ;;  %4292 = vmatprep.mubr.msk.f32.mxu1 %vm4584_vm0, %v4585_v11  ;;  %v2468_v21 = vld [vmem:[%s4756_s19 + $0x60] sm:$0xff] }
 0x16e   : > { %v960_v51 = vpop.f32.mrb[58].mxu0 }
 0x16f   : > { %v1086_v25 = vadd.f32 %v960_v51, %v5513_v23  ;;  %v3732_v14 = vpop.f32.mrb[59].mxu0  ;;  %4180 = vmatmul.mubr.f32.gmra.mrb[164].mxu0 %v2141_v8  ;;  %v1285_v41 = vpop.f32.mrb[58].mxu1 }
 0x170   : > { %v3845_v39 = vpop.f32.mrb[59].mxu1  ;;  %4293 = vmatmul.mubr.f32.gmra.mrb[164].mxu1 %v2466_v59  ;;  %4182 = vmatprep.mubr.msk.f32.mxu0 %vm4584_vm0, %v4585_v11  ;;  %v2144_v14 = vld [vmem:[%s4744_s10 + $0x68] sm:$0xff] }
 0x171   : > { %v5865_v42 = vadd.f32 %v1285_v41, %v1086_v25  ;;  %4295 = vmatprep.mubr.msk.f32.mxu1 %vm4584_vm0, %v4585_v11  ;;  %v2469_v39 = vld [vmem:[%s4756_s19 + $0x68] sm:$0xff] }
 0x172   : > { %v965_v18 = vpop.f32.mrb[60].mxu0 }
 0x173   : > { %v1087_v23 = vadd.f32 %v965_v18, %v5535_v16  ;;  %v3735_v29 = vpop.f32.mrb[61].mxu0  ;;  %4183 = vmatmul.mubr.f32.gmra.mrb[166].mxu0 %v2142_v63  ;;  %v1290_v44 = vpop.f32.mrb[60].mxu1 }
 0x174   : > { %v3848_v19 = vpop.f32.mrb[61].mxu1  ;;  %4296 = vmatmul.mubr.f32.gmra.mrb[166].mxu1 %v2467_v15  ;;  %4185 = vmatprep.mubr.msk.f32.mxu0 %vm4584_vm0, %v4585_v11  ;;  %v2145_v29 = vld [vmem:[%s4744_s10 + $0x70] sm:$0xff] }
 0x175   : > { %v5874_v31 = vadd.f32 %v1290_v44, %v1087_v23  ;;  %4298 = vmatprep.mubr.msk.f32.mxu1 %vm4584_vm0, %v4585_v11  ;;  %v2470_v19 = vld [vmem:[%s4756_s19 + $0x70] sm:$0xff] }
 0x176   : > { %v970_v8 = vpop.f32.mrb[62].mxu0 }
 0x177   : > { %v1088_v16 = vadd.f32 %v970_v8, %v5557_v37  ;;  %v3738_v59 = vpop.f32.mrb[63].mxu0  ;;  %4186 = vmatmul.mubr.f32.gmra.mrb[168].mxu0 %v2143_v30  ;;  %v1295_v51 = vpop.f32.mrb[62].mxu1 }
 0x178   : > { %v3851_v25 = vpop.f32.mrb[63].mxu1  ;;  %4299 = vmatmul.mubr.f32.gmra.mrb[168].mxu1 %v2468_v21  ;;  %4188 = vmatprep.mubr.msk.f32.mxu0 %vm4584_vm0, %v4585_v11  ;;  %v2146_v59 = vld [vmem:[%s4744_s10 + $0x78] sm:$0xff] }
 0x179   : > { %v5883_v41 = vadd.f32 %v1295_v51, %v1088_v16  ;;  %4301 = vmatprep.mubr.msk.f32.mxu1 %vm4584_vm0, %v4585_v11  ;;  %v2471_v25 = vld [vmem:[%s4756_s19 + $0x78] sm:$0xff] }
 0x17a   : > { %v975_v63 = vpop.f32.mrb[64].mxu0 }
 0x17b   : > { %v1089_v37 = vadd.f32 %v975_v63, %v5579_v26  ;;  %v3741_v15 = vpop.f32.mrb[65].mxu0  ;;  %4189 = vmatmul.mubr.f32.gmra.mrb[170].mxu0 %v2144_v14  ;;  %v1300_v18 = vpop.f32.mrb[64].mxu1 }
 0x17c   : > { %v3854_v23 = vpop.f32.mrb[65].mxu1  ;;  %4302 = vmatmul.mubr.f32.gmra.mrb[170].mxu1 %v2469_v39  ;;  %4191 = vmatprep.mubr.msk.f32.mxu0 %vm4584_vm0, %v4585_v11  ;;  %v2147_v15 = vld [vmem:[%s4744_s10 + $0x80] sm:$0xff] }
 0x17d   : > { %v5892_v44 = vadd.f32 %v1300_v18, %v1089_v37  ;;  %4304 = vmatprep.mubr.msk.f32.mxu1 %vm4584_vm0, %v4585_v11  ;;  %v2472_v23 = vld [vmem:[%s4756_s19 + $0x80] sm:$0xff] }
 0x17e   : > { %v980_v30 = vpop.f32.mrb[66].mxu0 }
 0x17f   : > { %v1090_v26 = vadd.f32 %v980_v30, %v5601_v46  ;;  %v3744_v21 = vpop.f32.mrb[67].mxu0  ;;  %4192 = vmatmul.mubr.f32.gmra.mrb[172].mxu0 %v2145_v29  ;;  %v1305_v8 = vpop.f32.mrb[66].mxu1 }
 0x180   : > { %v3857_v16 = vpop.f32.mrb[67].mxu1  ;;  %4305 = vmatmul.mubr.f32.gmra.mrb[172].mxu1 %v2470_v19  ;;  %4194 = vmatprep.mubr.msk.f32.mxu0 %vm4584_vm0, %v4585_v11  ;;  %v2148_v21 = vld [vmem:[%s4744_s10 + $0x88] sm:$0xff] }
 0x181   : > { %v5901_v51 = vadd.f32 %v1305_v8, %v1090_v26  ;;  %4307 = vmatprep.mubr.msk.f32.mxu1 %vm4584_vm0, %v4585_v11  ;;  %v2473_v16 = vld [vmem:[%s4756_s19 + $0x88] sm:$0xff] }
 0x182   : > { %v985_v14 = vpop.f32.mrb[68].mxu0 }
 0x183   : > { %v1091_v46 = vadd.f32 %v985_v14, %v5623_v35  ;;  %v3747_v39 = vpop.f32.mrb[69].mxu0  ;;  %4195 = vmatmul.mubr.f32.gmra.mrb[174].mxu0 %v2146_v59  ;;  %v1310_v63 = vpop.f32.mrb[68].mxu1 }
 0x184   : > { %v3860_v37 = vpop.f32.mrb[69].mxu1  ;;  %4308 = vmatmul.mubr.f32.gmra.mrb[174].mxu1 %v2471_v25  ;;  %4197 = vmatprep.mubr.msk.f32.mxu0 %vm4584_vm0, %v4585_v11  ;;  %v2149_v39 = vld [vmem:[%s4744_s10 + $0x90] sm:$0xff] }
 0x185   : > { %v5910_v18 = vadd.f32 %v1310_v63, %v1091_v46  ;;  %4310 = vmatprep.mubr.msk.f32.mxu1 %vm4584_vm0, %v4585_v11  ;;  %v2474_v37 = vld [vmem:[%s4756_s19 + $0x90] sm:$0xff] }
 0x186   : > { %v990_v29 = vpop.f32.mrb[70].mxu0 }
 0x187   : > { %v1092_v35 = vadd.f32 %v990_v29, %v5633_v61  ;;  %v3750_v19 = vpop.f32.mrb[71].mxu0  ;;  %4198 = vmatmul.mubr.f32.gmra.mrb[176].mxu0 %v2147_v15  ;;  %v1315_v30 = vpop.f32.mrb[70].mxu1 }
 0x188   : > { %v3863_v26 = vpop.f32.mrb[71].mxu1  ;;  %4311 = vmatmul.mubr.f32.gmra.mrb[176].mxu1 %v2472_v23  ;;  %4200 = vmatprep.mubr.msk.f32.mxu0 %vm4584_vm0, %v4585_v11  ;;  %v2150_v19 = vld [vmem:[%s4744_s10 + $0x98] sm:$0xff] }
 0x189   : > { %v5919_v8 = vadd.f32 %v1315_v30, %v1092_v35  ;;  %4313 = vmatprep.mubr.msk.f32.mxu1 %vm4584_vm0, %v4585_v11  ;;  %v2475_v26 = vld [vmem:[%s4756_s19 + $0x98] sm:$0xff] }
 0x18a   : > { %v995_v59 = vpop.f32.mrb[72].mxu0 }
 0x18b   : > { %v1093_v61 = vadd.f32 %v995_v59, %v5641_v62  ;;  %v3753_v25 = vpop.f32.mrb[73].mxu0  ;;  %4201 = vmatmul.mubr.f32.gmra.mrb[178].mxu0 %v2148_v21  ;;  %v1320_v14 = vpop.f32.mrb[72].mxu1 }
 0x18c   : > { %v3866_v46 = vpop.f32.mrb[73].mxu1  ;;  %4314 = vmatmul.mubr.f32.gmra.mrb[178].mxu1 %v2473_v16  ;;  %4203 = vmatprep.mubr.msk.f32.mxu0 %vm4584_vm0, %v4585_v11  ;;  %v2151_v25 = vld [vmem:[%s4744_s10 + $0xa0] sm:$0xff] }
 0x18d   : > { %v5928_v63 = vadd.f32 %v1320_v14, %v1093_v61  ;;  %4316 = vmatprep.mubr.msk.f32.mxu1 %vm4584_vm0, %v4585_v11 }
 0x18e   : > { %v1000_v15 = vpop.f32.mrb[74].mxu0 }
 0x18f   : > { %v1094_v62 = vadd.f32 %v1000_v15, %v5649_v48  ;;  %v3756_v23 = vpop.f32.mrb[75].mxu0  ;;  %4204 = vmatmul.mubr.f32.gmra.mrb[180].mxu0 %v2149_v39  ;;  %v1325_v29 = vpop.f32.mrb[74].mxu1 }
 0x190   : > { %v3869_v35 = vpop.f32.mrb[75].mxu1  ;;  %4317 = vmatmul.mubr.f32.gmra.mrb[180].mxu1 %v2474_v37  ;;  %4206 = vmatprep.mubr.msk.f32.mxu0 %vm4584_vm0, %v4585_v11 }
 0x191   : > { %v5937_v30 = vadd.f32 %v1325_v29, %v1094_v62  ;;  %4319 = vmatprep.mubr.msk.f32.mxu1 %vm4584_vm0, %v4585_v11 }
 0x192   : > { %v1005_v21 = vpop.f32.mrb[76].mxu0 }
 0x193   : > { %v1095_v16 = vadd.f32 %v1005_v21, %v5657_v28  ;;  %v3759_v48 = vpop.f32.mrb[77].mxu0  ;;  %4207 = vmatmul.mubr.f32.gmra.mrb[182].mxu0 %v2150_v19  ;;  %v1330_v59 = vpop.f32.mrb[76].mxu1 }
 0x194   : > { %v3872_v61 = vpop.f32.mrb[77].mxu1  ;;  %4320 = vmatmul.mubr.f32.gmra.mrb[182].mxu1 %v2475_v26  ;;  %4209 = vmatprep.mubr.msk.f32.mxu0 %vm4584_vm0, %v4585_v11 }
 0x195   : > { %v5946_v14 = vadd.f32 %v1330_v59, %v1095_v16  ;;  %4322 = vmatprep.mubr.msk.f32.mxu1 %vm4584_vm0, %v4585_v11 }
 0x196   : > { %v1010_v46 = vpop.f32.mrb[78].mxu0 }
 0x197   : > { %v1096_v39 = vadd.f32 %v1010_v46, %v5665_v49  ;;  %v3762_v37 = vpop.f32.mrb[79].mxu0  ;;  %4210 = vmatmul.mubr.f32.gmra.mrb[184].mxu0 %v2151_v25  ;;  %v1335_v28 = vpop.f32.mrb[78].mxu1 }
 0x198   : > { %v3875_v15 = vpop.f32.mrb[79].mxu1  ;;  %4323 = vmatmul.mubr.f32.gmra.mrb[184].mxu1 %v5689_v10  ;;  %4212 = vmatprep.mubr.msk.f32.mxu0 %vm4584_vm0, %v4585_v11 }
 0x199   : > { %v5954_v62 = vadd.f32 %v1335_v28, %v1096_v39  ;;  %4325 = vmatprep.mubr.msk.f32.mxu1 %vm4584_vm0, %v4585_v11 }
 0x19a   : > { %v1015_v23 = vpop.f32.mrb[80].mxu0 }
 0x19b   : > { %v1097_v29 = vadd.f32 %v1015_v23, %v5673_v45  ;;  %v3765_v35 = vpop.f32.mrb[81].mxu0  ;;  %4213 = vmatmul.mubr.f32.gmra.mrb[186].mxu0 %v5698_v13  ;;  %v1340_v49 = vpop.f32.mrb[80].mxu1 }
 0x19c   : > { %v3878_v19 = vpop.f32.mrb[81].mxu1  ;;  %4326 = vmatmul.mubr.f32.gmra.mrb[186].mxu1 %v5703_v53  ;;  %4215 = vmatprep.mubr.msk.f32.mxu0 %vm4584_vm0, %v4585_v11 }
 0x19d   : > { %v5963_v10 = vadd.f32 %v1340_v49, %v1097_v29  ;;  %4328 = vmatprep.mubr.msk.f32.mxu1 %vm4584_vm0, %v4585_v11  ;;  %v2483_v19 = vld [vmem:[%s4756_s19 + $0xd8] sm:$0xff] }
 0x19e   : > { %v1020_v26 = vpop.f32.mrb[82].mxu0 }
 0x19f   : > { %v1098_v21 = vadd.f32 %v1020_v26, %v5681_v52  ;;  %v3768_v16 = vpop.f32.mrb[83].mxu0  ;;  %4216 = vmatmul.mubr.f32.gmra.mrb[188].mxu0 %v5712_v40  ;;  %v1345_v45 = vpop.f32.mrb[82].mxu1 }
 0x1a0   : > { %v3881_v13 = vpop.f32.mrb[83].mxu1  ;;  %4329 = vmatmul.mubr.f32.gmra.mrb[188].mxu1 %v5717_v54  ;;  %4218 = vmatprep.mubr.msk.f32.mxu0 %vm4584_vm0, %v4585_v11 }
 0x1a1   : > { %v5972_v53 = vadd.f32 %v1345_v45, %v1098_v21  ;;  %4331 = vmatprep.mubr.msk.f32.mxu1 %vm4584_vm0, %v4585_v11  ;;  %v2484_v13 = vld [vmem:[%s4756_s19 + $0xe0] sm:$0xff] }
 0x1a2   : > { %v1025_v48 = vpop.f32.mrb[84].mxu0 }
 0x1a3   : > { %v1099_v59 = vadd.f32 %v1025_v48, %v5692_v12  ;;  %v3771_v61 = vpop.f32.mrb[85].mxu0  ;;  %4219 = vmatmul.mubr.f32.gmra.mrb[190].mxu0 %v5726_v33  ;;  %v1350_v52 = vpop.f32.mrb[84].mxu1 }
 0x1a4   : > { %v3884_v40 = vpop.f32.mrb[85].mxu1  ;;  %4332 = vmatmul.mubr.f32.gmra.mrb[190].mxu1 %v5731_v3  ;;  %4221 = vmatprep.mubr.msk.f32.mxu0 %vm4584_vm0, %v4585_v11 }
 0x1a5   : > { %v5981_v54 = vadd.f32 %v1350_v52, %v1099_v59  ;;  %4334 = vmatprep.mubr.msk.f32.mxu1 %vm4584_vm0, %v4585_v11  ;;  %v2160_v40 = vld [vmem:[%s4744_s10 + $0xe8] sm:$0xff] }
 0x1a6   : > { %v1030_v25 = vpop.f32.mrb[86].mxu0 }
 0x1a7   : > { %v1100_v46 = vadd.f32 %v1030_v25, %v5706_v36  ;;  %v3774_v39 = vpop.f32.mrb[87].mxu0  ;;  %4222 = vmatmul.mubr.f32.gmra.mrb[192].mxu0 %v5740_v1  ;;  %v1355_v12 = vpop.f32.mrb[86].mxu1 }
 0x1a8   : > { %v3887_v33 = vpop.f32.mrb[87].mxu1  ;;  %4335 = vmatmul.mubr.f32.gmra.mrb[192].mxu1 %v5745_v27  ;;  %4224 = vmatprep.mubr.msk.f32.mxu0 %vm4584_vm0, %v4585_v11 }
 0x1a9   : > { %v5990_v3 = vadd.f32 %v1355_v12, %v1100_v46  ;;  %4337 = vmatprep.mubr.msk.f32.mxu1 %vm4584_vm0, %v4585_v11  ;;  %v2485_v46 = vld [vmem:[%s4756_s19 + $0xe8] sm:$0xff] }
 0x1aa   : > { %v1035_v37 = vpop.f32.mrb[88].mxu0 }
 0x1ab   : > { %v1101_v28 = vadd.f32 %v1035_v37, %v5720_v55  ;;  %v3777_v15 = vpop.f32.mrb[89].mxu0  ;;  %4225 = vmatmul.mubr.f32.gmra.mrb[194].mxu0 %v5754_v5  ;;  %v1360_v36 = vpop.f32.mrb[88].mxu1 }
 0x1ac   : > { %v3890_v1 = vpop.f32.mrb[89].mxu1  ;;  %4338 = vmatmul.mubr.f32.gmra.mrb[194].mxu1 %v5759_v6  ;;  %4227 = vmatprep.mubr.msk.f32.mxu0 %vm4584_vm0, %v4585_v11  ;;  %v2158_v6 = vld [vmem:[%s4744_s10 + $0xd8] sm:$0xff] }
 0x1ad   : > { %v5999_v27 = vadd.f32 %v1360_v36, %v1101_v28  ;;  %4340 = vmatprep.mubr.msk.f32.mxu1 %vm4584_vm0, %v4585_v11 }
 0x1ae   : > { %v1040_v23 = vpop.f32.mrb[90].mxu0 }
 0x1af   : > { %v1102_v55 = vadd.f32 %v1040_v23, %v5734_v56  ;;  %v3780_v29 = vpop.f32.mrb[91].mxu0  ;;  %4228 = vmatmul.mubr.f32.gmra.mrb[196].mxu0 %v5768_v9  ;;  %v1365_v5 = vpop.f32.mrb[90].mxu1 }
 0x1b0   : > { %v3893_v35 = vpop.f32.mrb[91].mxu1  ;;  %4341 = vmatmul.mubr.f32.gmra.mrb[196].mxu1 %v5773_v50  ;;  %4230 = vmatprep.mubr.msk.f32.mxu0 %vm4584_vm0, %v4585_v11  ;;  %v2159_v50 = vld [vmem:[%s4744_s10 + $0xe0] sm:$0xff] }
 0x1b1   : > { %v6009_v49 = vadd.f32 %v1365_v5, %v1102_v55  ;;  %4343 = vmatprep.mubr.msk.f32.mxu1 %vm4584_vm0, %v4585_v11 }
 0x1b2   : > { %v1045_v56 = vpop.f32.mrb[92].mxu0 }
 0x1b3   : > { %v1103_v26 = vadd.f32 %v1045_v56, %v5748_v57  ;;  %v3783_v9 = vpop.f32.mrb[93].mxu0  ;;  %4231 = vmatmul.mubr.f32.gmra.mrb[198].mxu0 %v2158_v6  ;;  %v1370_v21 = vpop.f32.mrb[92].mxu1 }
 0x1b4   : > { %v3896_v16 = vpop.f32.mrb[93].mxu1  ;;  %4344 = vmatmul.mubr.f32.gmra.mrb[198].mxu1 %v2483_v19  ;;  %4233 = vmatprep.mubr.msk.f32.mxu0 %vm4584_vm0, %v4585_v11  ;;  %v2489_v9 = vld [vmem:[%s4756_s19 + $0x108] sm:$0xff] }
 0x1b5   : > { %v6018_v45 = vadd.f32 %v1370_v21, %v1103_v26  ;;  %4346 = vmatprep.mubr.msk.f32.mxu1 %vm4584_vm0, %v4585_v11 }
 0x1b6   : > { %v1050_v48 = vpop.f32.mrb[94].mxu0 }
 0x1b7   : > { %v1104_v57 = vadd.f32 %v1050_v48, %v5762_v47  ;;  %v3786_v59 = vpop.f32.mrb[95].mxu0  ;;  %4234 = vmatmul.mubr.f32.gmra.mrb[200].mxu0 %v2159_v50  ;;  %v1375_v61 = vpop.f32.mrb[94].mxu1  ;;  %v2490_v48 = vld [vmem:[%s4756_s19 + $0x110] sm:$0xff] }
 0x1b8   : > { %v3899_v52 = vpop.f32.mrb[95].mxu1  ;;  %4347 = vmatmul.mubr.f32.gmra.mrb[200].mxu1 %v2484_v13  ;;  %4236 = vmatprep.mubr.msk.f32.mxu0 %vm4584_vm0, %v4585_v11 }
 0x1b9   : > { %v6027_v25 = vadd.f32 %v1375_v61, %v1104_v57  ;;  %4349 = vmatprep.mubr.msk.f32.mxu1 %vm4584_vm0, %v4585_v11 }
 0x1ba   : > { %v1055_v39 = vpop.f32.mrb[96].mxu0 }
 0x1bb   : > { %v1105_v12 = vadd.f32 %v1055_v39, %v5776_v24  ;;  %v3789_v33 = vpop.f32.mrb[97].mxu0  ;;  %4237 = vmatmul.mubr.f32.gmra.mrb[202].mxu0 %v2160_v40  ;;  %v1380_v47 = vpop.f32.mrb[96].mxu1  ;;  %v2166_v40 = vld [vmem:[%s4744_s10 + $0x118] sm:$0xff] }
 0x1bc   : > { %v3902_v37 = vpop.f32.mrb[97].mxu1  ;;  %4350 = vmatmul.mubr.f32.gmra.mrb[202].mxu1 %v2485_v46  ;;  %4239 = vmatprep.mubr.msk.f32.mxu0 %vm4584_vm0, %v4585_v11  ;;  %v2491_v39 = vld [vmem:[%s4756_s19 + $0x118] sm:$0xff] }
 0x1bd   : > { %v6035_v28 = vadd.f32 %v1380_v47, %v1105_v12  ;;  %4352 = vmatprep.mubr.msk.f32.mxu1 %vm4584_vm0, %v4585_v11 }
 0x1be   : > { %v1060_v15 = vpop.f32.mrb[98].mxu0 }
 0x1bf   : > { %v1106_v36 = vadd.f32 %v1060_v15, %v5784_v38  ;;  %v3792_v1 = vpop.f32.mrb[99].mxu0  ;;  %4240 = vmatmul.mubr.f32.gmra.mrb[204].mxu0 %v5806_v20  ;;  %v1385_v24 = vpop.f32.mrb[98].mxu1 }
 0x1c0   : > { %v3905_v23 = vpop.f32.mrb[99].mxu1  ;;  %4353 = vmatmul.mubr.f32.gmra.mrb[204].mxu1 %v5811_v4  ;;  %4242 = vmatprep.mubr.msk.f32.mxu0 %vm4584_vm0, %v4585_v11 }
 0x1c1   : > { %v6044_v55 = vadd.f32 %v1385_v24, %v1106_v36  ;;  %4355 = vmatprep.mubr.msk.f32.mxu1 %vm4584_vm0, %v4585_v11 }
 0x1c2   : > { %v1065_v29 = vpop.f32.mrb[100].mxu0 }
 0x1c3   : > { %v1107_v5 = vadd.f32 %v1065_v29, %v5792_v43  ;;  %v3795_v35 = vpop.f32.mrb[101].mxu0  ;;  %4243 = vmatmul.mubr.f32.gmra.mrb[206].mxu0 %v5820_v22  ;;  %v1390_v38 = vpop.f32.mrb[100].mxu1 }
 0x1c4   : > { %v3908_v20 = vpop.f32.mrb[101].mxu1  ;;  %4356 = vmatmul.mubr.f32.gmra.mrb[206].mxu1 %v5825_v58  ;;  %4245 = vmatprep.mubr.msk.f32.mxu0 %vm4584_vm0, %v4585_v11  ;;  %v2164_v58 = vld [vmem:[%s4744_s10 + $0x108] sm:$0xff] }
 0x1c5   : > { %v6053_v4 = vadd.f32 %v1390_v38, %v1107_v5  ;;  %4358 = vmatprep.mubr.msk.f32.mxu1 %vm4584_vm0, %v4585_v11 }
 0x1c6   : > { %v1070_v6 = vpop.f32.mrb[102].mxu0 }
 0x1c7   : > { %v1108_v43 = vadd.f32 %v1070_v6, %v5800_v2  ;;  %v3798_v19 = vpop.f32.mrb[103].mxu0  ;;  %4246 = vmatmul.mubr.f32.gmra.mrb[208].mxu0 %v5834_v60  ;;  %v1395_v22 = vpop.f32.mrb[102].mxu1 }
 0x1c8   : > { %v3911_v56 = vpop.f32.mrb[103].mxu1  ;;  %4359 = vmatmul.mubr.f32.gmra.mrb[208].mxu1 %v5839_v32  ;;  %4248 = vmatprep.mubr.msk.f32.mxu0 %vm4584_vm0, %v4585_v11  ;;  %v2165_v32 = vld [vmem:[%s4744_s10 + $0x110] sm:$0xff] }
 0x1c9   : > { %v6063_v26 = vadd.f32 %v1395_v22, %v1108_v43  ;;  %4361 = vmatprep.mubr.msk.f32.mxu1 %vm4584_vm0, %v4585_v11 }
 0x1ca   : > { %v1075_v2 = vpop.f32.mrb[104].mxu0 }
 0x1cb   : > { %v1109_v21 = vadd.f32 %v1075_v2, %v5814_v7  ;;  %v3801_v60 = vpop.f32.mrb[105].mxu0  ;;  %4249 = vmatmul.mubr.f32.gmra.mrb[210].mxu0 %v2164_v58  ;;  %v1400_v16 = vpop.f32.mrb[104].mxu1 }
 0x1cc   : > { %v3914_v50 = vpop.f32.mrb[105].mxu1  ;;  %4362 = vmatmul.mubr.f32.gmra.mrb[210].mxu1 %v2489_v9  ;;  %4251 = vmatprep.mubr.msk.f32.mxu0 %vm4584_vm0, %v4585_v11 }
 0x1cd   : > { %v6072_v13 = vadd.f32 %v1400_v16, %v1109_v21  ;;  %4364 = vmatprep.mubr.msk.f32.mxu1 %vm4584_vm0, %v4585_v11 }
 0x1ce   : > { %v1080_v57 = vpop.f32.mrb[106].mxu0 }
 0x1cf   : > { %v1110_v7 = vadd.f32 %v1080_v57, %v5828_v34  ;;  %v3804_v59 = vpop.f32.mrb[107].mxu0  ;;  %4252 = vmatmul.mubr.f32.gmra.mrb[212].mxu0 %v2165_v32  ;;  %v1405_v61 = vpop.f32.mrb[106].mxu1 }
 0x1d0   : > { %v3917_v52 = vpop.f32.mrb[107].mxu1  ;;  %4365 = vmatmul.mubr.f32.gmra.mrb[212].mxu1 %v2490_v48  ;;  %4254 = vmatprep.mubr.msk.f32.mxu0 %vm4584_vm0, %v4585_v11 }
 0x1d1   : > { %v6081_v46 = vadd.f32 %v1405_v61, %v1110_v7  ;;  %4367 = vmatprep.mubr.msk.f32.mxu1 %vm4584_vm0, %v4585_v11 }
 0x1d2   : > { %v1600_v12 = vpop.f32.mrb[108].mxu0 }
 0x1d3   : > { %v1734_v33 = vadd.f32 %v1600_v12, %v5847_v0  ;;  %v3952_v47 = vpop.f32.mrb[109].mxu0  ;;  %4255 = vmatmul.mubr.f32.gmra.mrb[214].mxu0 %v2166_v40  ;;  %v1925_v34 = vpop.f32.mrb[108].mxu1 }
 0x1d4   : > { %v4065_v37 = vpop.f32.mrb[109].mxu1  ;;  %4368 = vmatmul.mubr.f32.gmra.mrb[214].mxu1 %v2491_v39 }
 0x1d5   : > { %v6087_v15 = vadd.f32 %v1925_v34, %v1734_v33 }
 0x1d6   : > { %v1605_v36 = vpop.f32.mrb[110].mxu0 }
 0x1d7   : > { %v1735_v1 = vadd.f32 %v1605_v36, %v5856_v17  ;;  %v3955_v24 = vpop.f32.mrb[111].mxu0  ;;  %v1930_v23 = vpop.f32.mrb[110].mxu1 }
 0x1d8   : > { %v4068_v29 = vpop.f32.mrb[111].mxu1 }
 0x1d9   : > { %v6090_v5 = vadd.f32 %v1930_v23, %v1735_v1 }
 0x1da   : > { %v1610_v11 = vpop.f32.mrb[112].mxu0 }
 0x1db   : > { %v1736_v35 = vadd.f32 %v1610_v11, %v5865_v42  ;;  %v3958_v38 = vpop.f32.mrb[113].mxu0  ;;  %v1935_v0 = vpop.f32.mrb[112].mxu1 }
 0x1dc   : > { %v4071_v20 = vpop.f32.mrb[113].mxu1 }
 0x1dd   : > { %v6093_v6 = vadd.f32 %v1935_v0, %v1736_v35 }
 0x1de   : > { %v1615_v43 = vpop.f32.mrb[114].mxu0 }
 0x1df   : > { %v1737_v19 = vadd.f32 %v1615_v43, %v5874_v31  ;;  %v3961_v22 = vpop.f32.mrb[115].mxu0  ;;  %v1940_v56 = vpop.f32.mrb[114].mxu1 }
 0x1e0   : > { %v4074_v58 = vpop.f32.mrb[115].mxu1 }
 0x1e1   : > { %v6096_v17 = vadd.f32 %v1940_v56, %v1737_v19 }
 0x1e2   : > { %v1620_v9 = vpop.f32.mrb[116].mxu0 }
 0x1e3   : > { %v1738_v2 = vadd.f32 %v1620_v9, %v5883_v41  ;;  %v3964_v21 = vpop.f32.mrb[117].mxu0  ;;  %v1945_v60 = vpop.f32.mrb[116].mxu1 }
 0x1e4   : > { %v4077_v16 = vpop.f32.mrb[117].mxu1 }
 0x1e5   : > { %v6099_v42 = vadd.f32 %v1945_v60, %v1738_v2 }
 0x1e6   : > { %v1625_v50 = vpop.f32.mrb[118].mxu0 }
 0x1e7   : > { %v1739_v32 = vadd.f32 %v1625_v50, %v5892_v44  ;;  %v3967_v48 = vpop.f32.mrb[119].mxu0  ;;  %v1950_v57 = vpop.f32.mrb[118].mxu1 }
 0x1e8   : > { %v4080_v7 = vpop.f32.mrb[119].mxu1 }
 0x1e9   : > { %v6102_v31 = vadd.f32 %v1950_v57, %v1739_v32 }
 0x1ea   : > { %v1630_v59 = vpop.f32.mrb[120].mxu0 }
 0x1eb   : > { %v1740_v61 = vadd.f32 %v1630_v59, %v5901_v51  ;;  %v3970_v52 = vpop.f32.mrb[121].mxu0  ;;  %v1955_v40 = vpop.f32.mrb[120].mxu1 }
 0x1ec   : > { %v4083_v39 = vpop.f32.mrb[121].mxu1 }
 0x1ed   : > { %v6105_v41 = vadd.f32 %v1955_v40, %v1740_v61 }
 0x1ee   : > { %v1635_v12 = vpop.f32.mrb[122].mxu0 }
 0x1ef   : > { %v1741_v33 = vadd.f32 %v1635_v12, %v5910_v18  ;;  %v3973_v47 = vpop.f32.mrb[123].mxu0  ;;  %v1960_v34 = vpop.f32.mrb[122].mxu1 }
 0x1f0   : > { %v4086_v37 = vpop.f32.mrb[123].mxu1 }
 0x1f1   : > { %v6108_v44 = vadd.f32 %v1960_v34, %v1741_v33 }
 0x1f2   : > { %v1640_v36 = vpop.f32.mrb[124].mxu0 }
 0x1f3   : > { %v1742_v1 = vadd.f32 %v1640_v36, %v5919_v8  ;;  %v3976_v24 = vpop.f32.mrb[125].mxu0  ;;  %v1965_v23 = vpop.f32.mrb[124].mxu1 }
 0x1f4   : > { %v4089_v29 = vpop.f32.mrb[125].mxu1 }
 0x1f5   : > { %v6111_v51 = vadd.f32 %v1965_v23, %v1742_v1 }
 0x1f6   : > { %v1645_v11 = vpop.f32.mrb[126].mxu0 }
 0x1f7   : > { %v1743_v35 = vadd.f32 %v1645_v11, %v5928_v63  ;;  %v3979_v38 = vpop.f32.mrb[127].mxu0  ;;  %v1970_v0 = vpop.f32.mrb[126].mxu1 }
 0x1f8   : > { %v4092_v20 = vpop.f32.mrb[127].mxu1 }
 0x1f9   : > { %v6114_v18 = vadd.f32 %v1970_v0, %v1743_v35 }
 0x1fa   : > { %v1650_v43 = vpop.f32.mrb[128].mxu0 }
 0x1fb   : > { %v1744_v19 = vadd.f32 %v1650_v43, %v5937_v30  ;;  %v3982_v22 = vpop.f32.mrb[129].mxu0  ;;  %v1975_v56 = vpop.f32.mrb[128].mxu1 }
 0x1fc   : > { %v4095_v58 = vpop.f32.mrb[129].mxu1 }
 0x1fd   : > { %v6117_v8 = vadd.f32 %v1975_v56, %v1744_v19 }
 0x1fe   : > { %v1655_v9 = vpop.f32.mrb[130].mxu0 }
 0x1ff   : > { %v1745_v2 = vadd.f32 %v1655_v9, %v5946_v14  ;;  %v3985_v21 = vpop.f32.mrb[131].mxu0  ;;  %v1980_v60 = vpop.f32.mrb[130].mxu1 }
 0x200   : > { %v4098_v16 = vpop.f32.mrb[131].mxu1 }
 0x201   : > { %v6120_v63 = vadd.f32 %v1980_v60, %v1745_v2 }
 0x202   : > { %v1660_v50 = vpop.f32.mrb[132].mxu0 }
 0x203   : > { %v1746_v32 = vadd.f32 %v1660_v50, %v5954_v62  ;;  %v3988_v48 = vpop.f32.mrb[133].mxu0  ;;  %v1985_v57 = vpop.f32.mrb[132].mxu1 }
 0x204   : > { %v4101_v7 = vpop.f32.mrb[133].mxu1 }
 0x205   : > { %v6123_v30 = vadd.f32 %v1985_v57, %v1746_v32 }
 0x206   : > { %v1665_v59 = vpop.f32.mrb[134].mxu0 }
 0x207   : > { %v1747_v61 = vadd.f32 %v1665_v59, %v5963_v10  ;;  %v3991_v52 = vpop.f32.mrb[135].mxu0  ;;  %v1990_v40 = vpop.f32.mrb[134].mxu1 }
 0x208   : > { %v4104_v39 = vpop.f32.mrb[135].mxu1 }
 0x209   : > { %v6126_v14 = vadd.f32 %v1990_v40, %v1747_v61 }
 0x20a   : > { %v1670_v12 = vpop.f32.mrb[136].mxu0 }
 0x20b   : > { %v1748_v33 = vadd.f32 %v1670_v12, %v5972_v53  ;;  %v3994_v47 = vpop.f32.mrb[137].mxu0  ;;  %v1995_v34 = vpop.f32.mrb[136].mxu1 }
 0x20c   : > { %v4107_v37 = vpop.f32.mrb[137].mxu1 }
 0x20d   : > { %v6129_v62 = vadd.f32 %v1995_v34, %v1748_v33 }
 0x20e   : > { %v1675_v36 = vpop.f32.mrb[138].mxu0 }
 0x20f   : > { %v1749_v1 = vadd.f32 %v1675_v36, %v5981_v54  ;;  %v3997_v24 = vpop.f32.mrb[139].mxu0  ;;  %v2000_v23 = vpop.f32.mrb[138].mxu1 }
 0x210   : > { %v4110_v29 = vpop.f32.mrb[139].mxu1 }
 0x211   : > { %v6132_v10 = vadd.f32 %v2000_v23, %v1749_v1 }
 0x212   : > { %v1680_v11 = vpop.f32.mrb[140].mxu0 }
 0x213   : > { %v1750_v35 = vadd.f32 %v1680_v11, %v5990_v3  ;;  %v4000_v38 = vpop.f32.mrb[141].mxu0  ;;  %v2005_v0 = vpop.f32.mrb[140].mxu1 }
 0x214   : > { %v4113_v20 = vpop.f32.mrb[141].mxu1 }
 0x215   : > { %v6135_v53 = vadd.f32 %v2005_v0, %v1750_v35 }
 0x216   : > { %v1685_v43 = vpop.f32.mrb[142].mxu0 }
 0x217   : > { %v1751_v19 = vadd.f32 %v1685_v43, %v5999_v27  ;;  %v4003_v22 = vpop.f32.mrb[143].mxu0  ;;  %v2010_v56 = vpop.f32.mrb[142].mxu1 }
 0x218   : > { %v4116_v58 = vpop.f32.mrb[143].mxu1 }
 0x219   : > { %v6138_v54 = vadd.f32 %v2010_v56, %v1751_v19 }
 0x21a   : > { %v1690_v9 = vpop.f32.mrb[144].mxu0 }
 0x21b   : > { %v1752_v2 = vadd.f32 %v1690_v9, %v6009_v49  ;;  %v4006_v21 = vpop.f32.mrb[145].mxu0  ;;  %v2015_v60 = vpop.f32.mrb[144].mxu1 }
 0x21c   : > { %v4119_v16 = vpop.f32.mrb[145].mxu1 }
 0x21d   : > { %v6141_v3 = vadd.f32 %v2015_v60, %v1752_v2 }
 0x21e   : > { %v1695_v50 = vpop.f32.mrb[146].mxu0 }
 0x21f   : > { %v1753_v32 = vadd.f32 %v1695_v50, %v6018_v45  ;;  %v4009_v48 = vpop.f32.mrb[147].mxu0  ;;  %v2020_v57 = vpop.f32.mrb[146].mxu1 }
 0x220   : > { %v4122_v7 = vpop.f32.mrb[147].mxu1 }
 0x221   : > { %v6144_v27 = vadd.f32 %v2020_v57, %v1753_v32 }
 0x222   : > { %v1700_v59 = vpop.f32.mrb[148].mxu0 }
 0x223   : > { %v1754_v61 = vadd.f32 %v1700_v59, %v6027_v25  ;;  %v4012_v52 = vpop.f32.mrb[149].mxu0  ;;  %v2025_v40 = vpop.f32.mrb[148].mxu1 }
 0x224   : > { %v4125_v39 = vpop.f32.mrb[149].mxu1 }
 0x225   : > { %v6147_v49 = vadd.f32 %v2025_v40, %v1754_v61 }
 0x226   : > { %v1705_v12 = vpop.f32.mrb[150].mxu0 }
 0x227   : > { %v1755_v33 = vadd.f32 %v1705_v12, %v6035_v28  ;;  %v4015_v47 = vpop.f32.mrb[151].mxu0  ;;  %v2030_v34 = vpop.f32.mrb[150].mxu1 }
 0x228   : > { %v4128_v37 = vpop.f32.mrb[151].mxu1 }
 0x229   : > { %v6150_v45 = vadd.f32 %v2030_v34, %v1755_v33 }
 0x22a   : > { %v1710_v36 = vpop.f32.mrb[152].mxu0 }
 0x22b   : > { %v1756_v1 = vadd.f32 %v1710_v36, %v6044_v55  ;;  %v4018_v24 = vpop.f32.mrb[153].mxu0  ;;  %v2035_v23 = vpop.f32.mrb[152].mxu1 }
 0x22c   : > { %v4131_v29 = vpop.f32.mrb[153].mxu1 }
 0x22d   : > { %v6153_v25 = vadd.f32 %v2035_v23, %v1756_v1 }
 0x22e   : > { %v1715_v11 = vpop.f32.mrb[154].mxu0 }
 0x22f   : > { %v1757_v35 = vadd.f32 %v1715_v11, %v6053_v4  ;;  %v4021_v38 = vpop.f32.mrb[155].mxu0  ;;  %v2040_v0 = vpop.f32.mrb[154].mxu1 }
 0x230   : > { %v4134_v20 = vpop.f32.mrb[155].mxu1 }
 0x231   : > { %v6156_v28 = vadd.f32 %v2040_v0, %v1757_v35 }
 0x232   : > { %v1720_v43 = vpop.f32.mrb[156].mxu0 }
 0x233   : > { %v1758_v19 = vadd.f32 %v1720_v43, %v6063_v26  ;;  %v4024_v22 = vpop.f32.mrb[157].mxu0  ;;  %v2045_v56 = vpop.f32.mrb[156].mxu1 }
 0x234   : > { %v4137_v58 = vpop.f32.mrb[157].mxu1 }
 0x235   : > { %v6159_v55 = vadd.f32 %v2045_v56, %v1758_v19 }
 0x236   : > { %v1725_v9 = vpop.f32.mrb[158].mxu0 }
 0x237   : > { %v1759_v2 = vadd.f32 %v1725_v9, %v6072_v13  ;;  %v4027_v21 = vpop.f32.mrb[159].mxu0  ;;  %v2050_v60 = vpop.f32.mrb[158].mxu1  ;;  %v6171_v13 = vld [vmem:[%s6265_s3] ss:$0 sm:$0xff] }
 0x238   : > { %v4140_v4 = vpop.f32.mrb[159].mxu1 }
 0x239   : > { %v6162_v16 = vadd.f32 %v2050_v60, %v1759_v2 }
 0x23a   : > { %v1730_v50 = vpop.f32.mrb[160].mxu0 }
 0x23b   : > { %v1760_v32 = vadd.f32 %v1730_v50, %v6081_v46  ;;  %v4030_v48 = vpop.f32.mrb[161].mxu0  ;;  %v2055_v57 = vpop.f32.mrb[160].mxu1 }
 0x23c   : > { %v4143_v26 = vpop.f32.mrb[161].mxu1 }
 0x23d   : > { %v6165_v7 = vadd.f32 %v2055_v57, %v1760_v32 }
 0x23e   : > { %v2250_v59 = vpop.f32.mrb[162].mxu0 }
 0x23f   : > { %v2384_v61 = vadd.f32 %v2250_v59, %v6087_v15  ;;  %v4178_v52 = vpop.f32.mrb[163].mxu0  ;;  %v2575_v40 = vpop.f32.mrb[162].mxu1 }
 0x240   : > { %v4291_v39 = vpop.f32.mrb[163].mxu1 }
 0x241   : > { %v2709_v12 = vadd.f32 %v2575_v40, %v2384_v61 }
 0x242   : > { %v2255_v33 = vpop.f32.mrb[164].mxu0 }
 0x243   : > { %v2797_v46 = vadd.f32 %v6171_v13, %v2709_v12  ;;  %v2385_v47 = vadd.f32 %v2255_v33, %v6090_v5  ;;  %v4181_v34 = vpop.f32.mrb[165].mxu0  ;;  %v2580_v37 = vpop.f32.mrb[164].mxu1 }
 0x244   : > { %v4294_v36 = vpop.f32.mrb[165].mxu1 }
 0x245   : > { %vm2824_vm1 = vcmp.gt.f32.partialorder %v2797_v46, 0.0  ;;  %v2851_v15 = vmul.f32 0.8664262, %v2797_v46  ;;  %v2710_v1 = vadd.f32 %v2580_v37, %v2385_v47 }
 0x246   : > { %v2260_v24 = vpop.f32.mrb[166].mxu0 }
 0x247   : > { %v2878_v23 = vsel %vm2824_vm1, %v2797_v46, %v2851_v15  ;;  %v2798_v29 = vadd.f32 %v6171_v13, %v2710_v1  ;;  %v2386_v11 = vadd.f32 %v2260_v24, %v6093_v6  ;;  %v4184_v5 = vpop.f32.mrb[167].mxu0  ;;  %v2585_v35 = vpop.f32.mrb[166].mxu1 }
 0x248   : > { %2905 = vst [vmem:[%s6179_s9] sm:$0xff] %v2878_v23  ;;  %v4297_v38 = vpop.f32.mrb[167].mxu1 }
 0x249   : > { %vm2825_vm2 = vcmp.gt.f32.partialorder %v2798_v29, 0.0  ;;  %v2852_v0 = vmul.f32 0.8664262, %v2798_v29  ;;  %v2711_v20 = vadd.f32 %v2585_v35, %v2386_v11 }
 0x24a   : > { %v2265_v43 = vpop.f32.mrb[168].mxu0 }
 0x24b   : > { %v2879_v19 = vsel %vm2825_vm2, %v2798_v29, %v2852_v0  ;;  %v2799_v22 = vadd.f32 %v6171_v13, %v2711_v20  ;;  %v2387_v56 = vadd.f32 %v2265_v43, %v6096_v17  ;;  %v4187_v58 = vpop.f32.mrb[169].mxu0  ;;  %v2590_v9 = vpop.f32.mrb[168].mxu1 }
 0x24c   : > { %2906 = vst [vmem:[%s6179_s9 + $0x8] sm:$0xff] %v2879_v19  ;;  %v4300_v2 = vpop.f32.mrb[169].mxu1 }
 0x24d   : > { %vm2826_vm3 = vcmp.gt.f32.partialorder %v2799_v22, 0.0  ;;  %v2853_v6 = vmul.f32 0.8664262, %v2799_v22  ;;  %v2712_v21 = vadd.f32 %v2590_v9, %v2387_v56 }
 0x24e   : > { %v2270_v60 = vpop.f32.mrb[170].mxu0 }
 0x24f   : > { %v2880_v4 = vsel %vm2826_vm3, %v2799_v22, %v2853_v6  ;;  %v2800_v50 = vadd.f32 %v6171_v13, %v2712_v21  ;;  %v2388_v32 = vadd.f32 %v2270_v60, %v6099_v42  ;;  %v4190_v48 = vpop.f32.mrb[171].mxu0  ;;  %v2595_v57 = vpop.f32.mrb[170].mxu1 }
 0x250   : > { %2907 = vst [vmem:[%s6179_s9 + $0x10] sm:$0xff] %v2880_v4  ;;  %v4303_v26 = vpop.f32.mrb[171].mxu1 }
 0x251   : > { %vm2827_vm4 = vcmp.gt.f32.partialorder %v2800_v50, 0.0  ;;  %v2854_v17 = vmul.f32 0.8664262, %v2800_v50  ;;  %v2713_v59 = vadd.f32 %v2595_v57, %v2388_v32 }
 0x252   : > { %v2275_v61 = vpop.f32.mrb[172].mxu0 }
 0x253   : > { %v2881_v52 = vsel %vm2827_vm4, %v2800_v50, %v2854_v17  ;;  %v2801_v40 = vadd.f32 %v6171_v13, %v2713_v59  ;;  %v2389_v39 = vadd.f32 %v2275_v61, %v6102_v31  ;;  %v4193_v12 = vpop.f32.mrb[173].mxu0  ;;  %v2600_v33 = vpop.f32.mrb[172].mxu1 }
 0x254   : > { %2908 = vst [vmem:[%s6179_s9 + $0x18] sm:$0xff] %v2881_v52  ;;  %v4306_v46 = vpop.f32.mrb[173].mxu1 }
 0x255   : > { %vm2828_vm5 = vcmp.gt.f32.partialorder %v2801_v40, 0.0  ;;  %v2855_v42 = vmul.f32 0.8664262, %v2801_v40  ;;  %v2714_v47 = vadd.f32 %v2600_v33, %v2389_v39 }
 0x256   : > { %v2280_v34 = vpop.f32.mrb[174].mxu0 }
 0x257   : > { %v2882_v37 = vsel %vm2828_vm5, %v2801_v40, %v2855_v42  ;;  %v2802_v36 = vadd.f32 %v6171_v13, %v2714_v47  ;;  %v2390_v15 = vadd.f32 %v2280_v34, %v6105_v41  ;;  %v4196_v1 = vpop.f32.mrb[175].mxu0  ;;  %v2605_v24 = vpop.f32.mrb[174].mxu1 }
 0x258   : > { %2909 = vst [vmem:[%s6179_s9 + $0x20] sm:$0xff] %v2882_v37  ;;  %v4309_v23 = vpop.f32.mrb[175].mxu1 }
 0x259   : > { %vm2829_vm6 = vcmp.gt.f32.partialorder %v2802_v36, 0.0  ;;  %v2856_v31 = vmul.f32 0.8664262, %v2802_v36  ;;  %v2715_v29 = vadd.f32 %v2605_v24, %v2390_v15 }
 0x25a   : > { %v2285_v11 = vpop.f32.mrb[176].mxu0 }
 0x25b   : > { %v2883_v5 = vsel %vm2829_vm6, %v2802_v36, %v2856_v31  ;;  %v2803_v35 = vadd.f32 %v6171_v13, %v2715_v29  ;;  %v2391_v38 = vadd.f32 %v2285_v11, %v6108_v44  ;;  %v4199_v0 = vpop.f32.mrb[177].mxu0  ;;  %v2610_v20 = vpop.f32.mrb[176].mxu1 }
 0x25c   : > { %2910 = vst [vmem:[%s6179_s9 + $0x28] sm:$0xff] %v2883_v5  ;;  %v4312_v43 = vpop.f32.mrb[177].mxu1 }
 0x25d   : > { %vm2830_vm7 = vcmp.gt.f32.partialorder %v2803_v35, 0.0  ;;  %v2857_v41 = vmul.f32 0.8664262, %v2803_v35  ;;  %v2716_v19 = vadd.f32 %v2610_v20, %v2391_v38 }
 0x25e   : > { %v2290_v22 = vpop.f32.mrb[178].mxu0 }
 0x25f   : > { %v2884_v56 = vsel %vm2830_vm7, %v2803_v35, %v2857_v41  ;;  %v2804_v58 = vadd.f32 %v6171_v13, %v2716_v19  ;;  %v2392_v9 = vadd.f32 %v2290_v22, %v6111_v51  ;;  %v4202_v2 = vpop.f32.mrb[179].mxu0  ;;  %v2615_v6 = vpop.f32.mrb[178].mxu1 }
 0x260   : > { %2911 = vst [vmem:[%s6179_s9 + $0x30] sm:$0xff] %v2884_v56  ;;  %v4315_v21 = vpop.f32.mrb[179].mxu1 }
 0x261   : > { %vm2831_vm8 = vcmp.gt.f32.partialorder %v2804_v58, 0.0  ;;  %v2858_v44 = vmul.f32 0.8664262, %v2804_v58  ;;  %v2717_v60 = vadd.f32 %v2615_v6, %v2392_v9 }
 0x262   : > { %v2295_v4 = vpop.f32.mrb[180].mxu0 }
 0x263   : > { %v2885_v50 = vsel %vm2831_vm8, %v2804_v58, %v2858_v44  ;;  %v2805_v32 = vadd.f32 %v6171_v13, %v2717_v60  ;;  %v2393_v48 = vadd.f32 %v2295_v4, %v6114_v18  ;;  %v4205_v57 = vpop.f32.mrb[181].mxu0  ;;  %v2620_v26 = vpop.f32.mrb[180].mxu1 }
 0x264   : > { %2912 = vst [vmem:[%s6179_s9 + $0x38] sm:$0xff] %v2885_v50  ;;  %v4318_v17 = vpop.f32.mrb[181].mxu1 }
 0x265   : > { %vm2832_vm9 = vcmp.gt.f32.partialorder %v2805_v32, 0.0  ;;  %v2859_v51 = vmul.f32 0.8664262, %v2805_v32  ;;  %v2718_v59 = vadd.f32 %v2620_v26, %v2393_v48 }
 0x266   : > { %v2300_v61 = vpop.f32.mrb[182].mxu0 }
 0x267   : > { %v2886_v52 = vsel %vm2832_vm9, %v2805_v32, %v2859_v51  ;;  %v2806_v40 = vadd.f32 %v6171_v13, %v2718_v59  ;;  %v2394_v39 = vadd.f32 %v2300_v61, %v6117_v8  ;;  %v4208_v12 = vpop.f32.mrb[183].mxu0  ;;  %v2625_v33 = vpop.f32.mrb[182].mxu1 }
 0x268   : > { %2913 = vst [vmem:[%s6179_s9 + $0x40] sm:$0xff] %v2886_v52  ;;  %v4321_v46 = vpop.f32.mrb[183].mxu1 }
 0x269   : > { %vm2833_vm10 = vcmp.gt.f32.partialorder %v2806_v40, 0.0  ;;  %v2860_v18 = vmul.f32 0.8664262, %v2806_v40  ;;  %v2719_v42 = vadd.f32 %v2625_v33, %v2394_v39 }
 0x26a   : > { %v2305_v47 = vpop.f32.mrb[184].mxu0 }
 0x26b   : > { %v2887_v34 = vsel %vm2833_vm10, %v2806_v40, %v2860_v18  ;;  %v2807_v37 = vadd.f32 %v6171_v13, %v2719_v42  ;;  %v2395_v36 = vadd.f32 %v2305_v47, %v6120_v63  ;;  %v4211_v15 = vpop.f32.mrb[185].mxu0  ;;  %v2630_v1 = vpop.f32.mrb[184].mxu1 }
 0x26c   : > { %2914 = vst [vmem:[%s6179_s9 + $0x48] sm:$0xff] %v2887_v34  ;;  %v4324_v24 = vpop.f32.mrb[185].mxu1 }
 0x26d   : > { %vm2834_vm11 = vcmp.gt.f32.partialorder %v2807_v37, 0.0  ;;  %v2861_v8 = vmul.f32 0.8664262, %v2807_v37  ;;  %v2720_v23 = vadd.f32 %v2630_v1, %v2395_v36 }
 0x26e   : > { %v2310_v31 = vpop.f32.mrb[186].mxu0 }
 0x26f   : > { %v2888_v29 = vsel %vm2834_vm11, %v2807_v37, %v2861_v8  ;;  %v2808_v11 = vadd.f32 %v6171_v13, %v2720_v23  ;;  %v2396_v5 = vadd.f32 %v2310_v31, %v6123_v30  ;;  %v4214_v35 = vpop.f32.mrb[187].mxu0  ;;  %v2635_v38 = vpop.f32.mrb[186].mxu1 }
 0x270   : > { %2915 = vst [vmem:[%s6179_s9 + $0x50] sm:$0xff] %v2888_v29  ;;  %v4327_v0 = vpop.f32.mrb[187].mxu1 }
 0x271   : > { %vm2835_vm12 = vcmp.gt.f32.partialorder %v2808_v11, 0.0  ;;  %v2862_v63 = vmul.f32 0.8664262, %v2808_v11  ;;  %v2721_v20 = vadd.f32 %v2635_v38, %v2396_v5 }
 0x272   : > { %v2315_v43 = vpop.f32.mrb[188].mxu0 }
 0x273   : > { %v2889_v41 = vsel %vm2835_vm12, %v2808_v11, %v2862_v63  ;;  %v2809_v19 = vadd.f32 %v6171_v13, %v2721_v20  ;;  %v2397_v22 = vadd.f32 %v2315_v43, %v6126_v14  ;;  %v4217_v56 = vpop.f32.mrb[189].mxu0  ;;  %v2640_v58 = vpop.f32.mrb[188].mxu1 }
 0x274   : > { %2916 = vst [vmem:[%s6179_s9 + $0x58] sm:$0xff] %v2889_v41  ;;  %v4330_v9 = vpop.f32.mrb[189].mxu1 }
 0x275   : > { %vm2836_vm13 = vcmp.gt.f32.partialorder %v2809_v19, 0.0  ;;  %v2863_v30 = vmul.f32 0.8664262, %v2809_v19  ;;  %v2722_v2 = vadd.f32 %v2640_v58, %v2397_v22 }
 0x276   : > { %v2320_v6 = vpop.f32.mrb[190].mxu0 }
 0x277   : > { %v2890_v21 = vsel %vm2836_vm13, %v2809_v19, %v2863_v30  ;;  %v2810_v44 = vadd.f32 %v6171_v13, %v2722_v2  ;;  %v2398_v60 = vadd.f32 %v2320_v6, %v6129_v62  ;;  %v4220_v4 = vpop.f32.mrb[191].mxu0  ;;  %v2645_v50 = vpop.f32.mrb[190].mxu1 }
 0x278   : > { %2917 = vst [vmem:[%s6179_s9 + $0x60] sm:$0xff] %v2890_v21  ;;  %v4333_v32 = vpop.f32.mrb[191].mxu1 }
 0x279   : > { %vm2837_vm14 = vcmp.gt.f32.partialorder %v2810_v44, 0.0  ;;  %v2864_v14 = vmul.f32 0.8664262, %v2810_v44  ;;  %v2723_v48 = vadd.f32 %v2645_v50, %v2398_v60 }
 0x27a   : > { %v2325_v57 = vpop.f32.mrb[192].mxu0 }
 0x27b   : > { %v2891_v26 = vsel %vm2837_vm14, %v2810_v44, %v2864_v14  ;;  %v2811_v17 = vadd.f32 %v6171_v13, %v2723_v48  ;;  %v2399_v51 = vadd.f32 %v2325_v57, %v6132_v10  ;;  %v4223_v59 = vpop.f32.mrb[193].mxu0  ;;  %v2650_v61 = vpop.f32.mrb[192].mxu1 }
 0x27c   : > { %2918 = vst [vmem:[%s6179_s9 + $0x68] sm:$0xff] %v2891_v26  ;;  %v4336_v52 = vpop.f32.mrb[193].mxu1 }
 0x27d   : > { %vm2838_vm15 = vcmp.gt.f32.partialorder %v2811_v17, 0.0  ;;  %v2865_v62 = vmul.f32 0.8664262, %v2811_v17  ;;  %v2724_v40 = vadd.f32 %v2650_v61, %v2399_v51 }
 0x27e   : > { %v2330_v39 = vpop.f32.mrb[194].mxu0 }
 0x27f   : > { %v2892_v12 = vsel %vm2838_vm15, %v2811_v17, %v2865_v62  ;;  %v2812_v33 = vadd.f32 %v6171_v13, %v2724_v40  ;;  %v2400_v46 = vadd.f32 %v2330_v39, %v6135_v53  ;;  %v4226_v18 = vpop.f32.mrb[195].mxu0  ;;  %v2655_v42 = vpop.f32.mrb[194].mxu1 }
 0x280   : > { %2919 = vst [vmem:[%s6179_s9 + $0x70] sm:$0xff] %v2892_v12  ;;  %v4339_v47 = vpop.f32.mrb[195].mxu1 }
 0x281   : > { %vm2839_vm0 = vcmp.gt.f32.partialorder %v2812_v33, 0.0  ;;  %v2866_v10 = vmul.f32 0.8664262, %v2812_v33  ;;  %v2725_v34 = vadd.f32 %v2655_v42, %v2400_v46 }
 0x282   : > { %v2335_v37 = vpop.f32.mrb[196].mxu0 }
 0x283   : > { %v2893_v36 = vsel %vm2839_vm0, %v2812_v33, %v2866_v10  ;;  %v2813_v15 = vadd.f32 %v6171_v13, %v2725_v34  ;;  %v2401_v1 = vadd.f32 %v2335_v37, %v6138_v54  ;;  %v4229_v24 = vpop.f32.mrb[197].mxu0  ;;  %v2660_v8 = vpop.f32.mrb[196].mxu1 }
 0x284   : > { %2920 = vst [vmem:[%s6179_s9 + $0x78] sm:$0xff] %v2893_v36  ;;  %v4342_v23 = vpop.f32.mrb[197].mxu1 }
 0x285   : > { %vm2840_vm1 = vcmp.gt.f32.partialorder %v2813_v15, 0.0  ;;  %v2867_v53 = vmul.f32 0.8664262, %v2813_v15  ;;  %v2726_v31 = vadd.f32 %v2660_v8, %v2401_v1 }
 0x286   : > { %v2340_v29 = vpop.f32.mrb[198].mxu0 }
 0x287   : > { %v2894_v11 = vsel %vm2840_vm1, %v2813_v15, %v2867_v53  ;;  %v2814_v5 = vadd.f32 %v6171_v13, %v2726_v31  ;;  %v2402_v35 = vadd.f32 %v2340_v29, %v6141_v3  ;;  %v4232_v38 = vpop.f32.mrb[199].mxu0  ;;  %v2665_v0 = vpop.f32.mrb[198].mxu1 }
 0x288   : > { %2921 = vst [vmem:[%s6179_s9 + $0x80] sm:$0xff] %v2894_v11  ;;  %v4345_v63 = vpop.f32.mrb[199].mxu1 }
 0x289   : > { %vm2841_vm2 = vcmp.gt.f32.partialorder %v2814_v5, 0.0  ;;  %v2868_v54 = vmul.f32 0.8664262, %v2814_v5  ;;  %v2727_v20 = vadd.f32 %v2665_v0, %v2402_v35 }
 0x28a   : > { %v2345_v43 = vpop.f32.mrb[200].mxu0 }
 0x28b   : > { %v2895_v41 = vsel %vm2841_vm2, %v2814_v5, %v2868_v54  ;;  %v2815_v19 = vadd.f32 %v6171_v13, %v2727_v20  ;;  %v2403_v22 = vadd.f32 %v2345_v43, %v6144_v27  ;;  %v4235_v56 = vpop.f32.mrb[201].mxu0  ;;  %v2670_v58 = vpop.f32.mrb[200].mxu1 }
 0x28c   : > { %2922 = vst [vmem:[%s6179_s9 + $0x88] sm:$0xff] %v2895_v41  ;;  %v4348_v9 = vpop.f32.mrb[201].mxu1 }
 0x28d   : > { %vm2842_vm3 = vcmp.gt.f32.partialorder %v2815_v19, 0.0  ;;  %v2869_v3 = vmul.f32 0.8664262, %v2815_v19  ;;  %v2728_v30 = vadd.f32 %v2670_v58, %v2403_v22 }
 0x28e   : > { %v2350_v2 = vpop.f32.mrb[202].mxu0 }
 0x28f   : > { %v2896_v6 = vsel %vm2842_vm3, %v2815_v19, %v2869_v3  ;;  %v2816_v21 = vadd.f32 %v6171_v13, %v2728_v30  ;;  %v2404_v44 = vadd.f32 %v2350_v2, %v6147_v49  ;;  %v4238_v60 = vpop.f32.mrb[203].mxu0  ;;  %v2675_v4 = vpop.f32.mrb[202].mxu1 }
 0x290   : > { %2923 = vst [vmem:[%s6179_s9 + $0x90] sm:$0xff] %v2896_v6  ;;  %v4351_v50 = vpop.f32.mrb[203].mxu1 }
 0x291   : > { %vm2843_vm4 = vcmp.gt.f32.partialorder %v2816_v21, 0.0  ;;  %v2870_v27 = vmul.f32 0.8664262, %v2816_v21  ;;  %v2729_v32 = vadd.f32 %v2675_v4, %v2404_v44 }
 0x292   : > { %v2355_v14 = vpop.f32.mrb[204].mxu0 }
 0x293   : > { %v2897_v48 = vsel %vm2843_vm4, %v2816_v21, %v2870_v27  ;;  %v2817_v57 = vadd.f32 %v6171_v13, %v2729_v32  ;;  %v2405_v26 = vadd.f32 %v2355_v14, %v6150_v45  ;;  %v4241_v17 = vpop.f32.mrb[205].mxu0  ;;  %v2680_v51 = vpop.f32.mrb[204].mxu1 }
 0x294   : > { %2924 = vst [vmem:[%s6179_s9 + $0x98] sm:$0xff] %v2897_v48  ;;  %v4354_v59 = vpop.f32.mrb[205].mxu1 }
 0x295   : > { %vm2844_vm5 = vcmp.gt.f32.partialorder %v2817_v57, 0.0  ;;  %v2871_v49 = vmul.f32 0.8664262, %v2817_v57  ;;  %v2730_v61 = vadd.f32 %v2680_v51, %v2405_v26 }
 0x296   : > { %v2360_v52 = vpop.f32.mrb[206].mxu0 }
 0x297   : > { %v2898_v62 = vsel %vm2844_vm5, %v2817_v57, %v2871_v49  ;;  %v2818_v40 = vadd.f32 %v6171_v13, %v2730_v61  ;;  %v2406_v39 = vadd.f32 %v2360_v52, %v6153_v25  ;;  %v4244_v12 = vpop.f32.mrb[207].mxu0  ;;  %v2685_v33 = vpop.f32.mrb[206].mxu1 }
 0x298   : > { %2925 = vst [vmem:[%s6179_s9 + $0xa0] sm:$0xff] %v2898_v62  ;;  %v4357_v46 = vpop.f32.mrb[207].mxu1 }
 0x299   : > { %vm2845_vm6 = vcmp.gt.f32.partialorder %v2818_v40, 0.0  ;;  %v2872_v45 = vmul.f32 0.8664262, %v2818_v40  ;;  %v2731_v18 = vadd.f32 %v2685_v33, %v2406_v39 }
 0x29a   : > { %v2365_v42 = vpop.f32.mrb[208].mxu0 }
 0x29b   : > { %v2899_v47 = vsel %vm2845_vm6, %v2818_v40, %v2872_v45  ;;  %v2819_v10 = vadd.f32 %v6171_v13, %v2731_v18  ;;  %v2407_v34 = vadd.f32 %v2365_v42, %v6156_v28  ;;  %v4247_v37 = vpop.f32.mrb[209].mxu0  ;;  %v2690_v36 = vpop.f32.mrb[208].mxu1 }
 0x29c   : > { %2926 = vst [vmem:[%s6179_s9 + $0xa8] sm:$0xff] %v2899_v47  ;;  %v4360_v15 = vpop.f32.mrb[209].mxu1 }
 0x29d   : > { %vm2846_vm7 = vcmp.gt.f32.partialorder %v2819_v10, 0.0  ;;  %v2873_v25 = vmul.f32 0.8664262, %v2819_v10  ;;  %v2732_v1 = vadd.f32 %v2690_v36, %v2407_v34 }
 0x29e   : > { %v2370_v24 = vpop.f32.mrb[210].mxu0 }
 0x29f   : > { %v2900_v8 = vsel %vm2846_vm7, %v2819_v10, %v2873_v25  ;;  %v2820_v23 = vadd.f32 %v6171_v13, %v2732_v1  ;;  %v2408_v53 = vadd.f32 %v2370_v24, %v6159_v55  ;;  %v4250_v31 = vpop.f32.mrb[211].mxu0  ;;  %v2695_v29 = vpop.f32.mrb[210].mxu1 }
 0x2a0   : > { %2927 = vst [vmem:[%s6179_s9 + $0xb0] sm:$0xff] %v2900_v8  ;;  %v4363_v11 = vpop.f32.mrb[211].mxu1 }
 0x2a1   : > { %vm2847_vm8 = vcmp.gt.f32.partialorder %v2820_v23, 0.0  ;;  %v2874_v28 = vmul.f32 0.8664262, %v2820_v23  ;;  %v2733_v5 = vadd.f32 %v2695_v29, %v2408_v53 }
 0x2a2   : > { %v2375_v35 = vpop.f32.mrb[212].mxu0 }
 0x2a3   : > { %v2901_v38 = vsel %vm2847_vm8, %v2820_v23, %v2874_v28  ;;  %v2821_v0 = vadd.f32 %v6171_v13, %v2733_v5  ;;  %v2409_v63 = vadd.f32 %v2375_v35, %v6162_v16  ;;  %v4253_v54 = vpop.f32.mrb[213].mxu0  ;;  %v2700_v20 = vpop.f32.mrb[212].mxu1 }
 0x2a4   : > { %2928 = vst [vmem:[%s6179_s9 + $0xb8] sm:$0xff] %v2901_v38  ;;  %v4366_v43 = vpop.f32.mrb[213].mxu1 }
 0x2a5   : > { %vm2848_vm9 = vcmp.gt.f32.partialorder %v2821_v0, 0.0  ;;  %v2875_v55 = vmul.f32 0.8664262, %v2821_v0  ;;  %v2734_v41 = vadd.f32 %v2700_v20, %v2409_v63 }
 0x2a6   : > { %v2380_v19 = vpop.f32.mrb[214].mxu0 }
 0x2a7   : > { %v2902_v22 = vsel %vm2848_vm9, %v2821_v0, %v2875_v55  ;;  %v2822_v56 = vadd.f32 %v6171_v13, %v2734_v41  ;;  %v2410_v58 = vadd.f32 %v2380_v19, %v6165_v7  ;;  %v4256_v9 = vpop.f32.mrb[215].mxu0  ;;  %v2705_v3 = vpop.f32.mrb[214].mxu1 }
 0x2a8   : > { %2929 = vst [vmem:[%s6179_s9 + $0xc0] sm:$0xff] %v2902_v22  ;;  %v4369_v30 = vpop.f32.mrb[215].mxu1 }
 0x2a9   : > { %vm2849_vm10 = vcmp.gt.f32.partialorder %v2822_v56, 0.0  ;;  %v2876_v16 = vmul.f32 0.8664262, %v2822_v56  ;;  %v2735_v2 = vadd.f32 %v2705_v3, %v2410_v58 }
 0x2ab   : > { %v2903_v6 = vsel %vm2849_vm10, %v2822_v56, %v2876_v16  ;;  %v2823_v21 = vadd.f32 %v6171_v13, %v2735_v2 }
 0x2ac   : > { %2930 = vst [vmem:[%s6179_s9 + $0xc8] sm:$0xff] %v2903_v6 }
 0x2ad   : > { %vm2850_vm11 = vcmp.gt.f32.partialorder %v2823_v21, 0.0  ;;  %v2877_v44 = vmul.f32 0.8664262, %v2823_v21 }
 0x2af   : > { %v2904_v60 = vsel %vm2850_vm11, %v2823_v21, %v2877_v44 }
 0x2b0   : > { %2931 = vst [vmem:[%s6179_s9 + $0xd0] sm:$0xff] %v2904_v60 }
 0x2b1 PF: > { %s14_s15 = sadd.s32 1, %s4581_s15  }
 0x2b2   : > { %p11_p4 = scmp.ge.s32.totalorder %s14_s15, 4  }
 0x2b4   :  { %13 = sbr.rel (!%p11_p4) target bundleno = 1 (0x1), region = 76 }

</bundles_post_ra>
